<compile_context>
chip_gen: v5e
topology: v5e:2x2
jax: 0.10.0
libtpu: 0.0.40
codegen_flags: <defaults>
</compile_context>

<pallas_src>
import functools

import jax
import jax.numpy as jnp
from jax import lax
from jax.experimental import pallas as pl
from jax.experimental.pallas import tpu as pltpu


def _mha_kernel(q_ref, k_ref, v_ref, wq_ref, wk_ref, wv_ref, wo_ref, b_ref,
                o_ref, k_sc, v_sc, *, n_head, d_head, scale_inv):
    # q_ref : (1, TQ, Dq)   query tile for the current batch element
    # k_ref : (1, Nk, Dk)   full key sequence for the current batch element
    # v_ref : (1, Nk, Dv)   full value sequence
    # wq/wk/wv_ref : (D*, H*dh)  fused projection weights (all heads)
    # wo_ref : (H*dh, Dq)   output projection,  b_ref : (1, Dq) bias
    # o_ref  : (1, TQ, Dq)  output tile (written exactly once)
    # k_sc/v_sc : VMEM (Nk, H, dh) per-head scratch, reused across query tiles
    qt = pl.program_id(2)
    cdt = k_sc.dtype                      # MXU operand dtype (f32 or bf16)

    # K/V projections once per batch element (per core split); the lane-split
    # relayout to per-head layout is paid here, not in the per-tile hot path.
    @pl.when(qt == 0)
    def _():
        kp = jnp.dot(k_ref[0], wk_ref[...], preferred_element_type=jnp.float32)
        vp = jnp.dot(v_ref[0], wv_ref[...], preferred_element_type=jnp.float32)
        nk = kp.shape[0]
        k_sc[...] = kp.reshape(nk, n_head, d_head).astype(cdt)
        v_sc[...] = vp.reshape(nk, n_head, d_head).astype(cdt)

    # Q projection (lane-dense, all heads); fold 1/scale here.
    q = jnp.dot(q_ref[0], wq_ref[...], preferred_element_type=jnp.float32)
    q = (q * scale_inv).astype(cdt)                       # (TQ, H*dh)
    tq = q.shape[0]
    qh = q.reshape(tq, n_head, d_head)                    # (TQ, H, dh)

    # sim[h, i, j] = sum_d q[i,h,d] * k[j,h,d]   (no explicit transpose)
    sim = lax.dot_general(
        qh, k_sc[...],
        dimension_numbers=(((2,), (2,)), ((1,), (1,))),
        preferred_element_type=jnp.float32)               # (H, TQ, Nk) f32

    # numerically-stable softmax over keys; normalization is DEFERRED:
    # feed the unnormalized exp into attn@V and divide the (H, TQ, dh) result.
    sim_max = jnp.max(sim, axis=-1, keepdims=True)
    p = jnp.exp(sim - sim_max)                            # (H, TQ, Nk) f32
    l = jnp.sum(p, axis=-1, keepdims=True)                # (H, TQ, 1)  f32

    # out[h, i, d] = sum_j p[h,i,j] * v[j,h,d]
    out = lax.dot_general(
        p.astype(cdt), v_sc[...],
        dimension_numbers=(((2,), (0,)), ((0,), (1,))),
        preferred_element_type=jnp.float32)               # (H, TQ, dh) f32
    out = out * pl.reciprocal(l, approx=True)             # H*TQ*dh multiplies

    # concat heads -> (TQ, H*dh), single full-width output projection + bias.
    out = out.transpose(1, 0, 2).reshape(tq, n_head * d_head).astype(cdt)
    y = jnp.dot(out, wo_ref[...], preferred_element_type=jnp.float32)
    o_ref[0] = (y + b_ref[...]).astype(o_ref.dtype)


def _rup(x, m):
    return -(-x // m) * m


def _padded_bytes(shape, itemsize):
    """VMEM footprint of one buffer, with (8, 128) padding on the minor dims."""
    if len(shape) == 1:
        return _rup(shape[0], 128) * itemsize
    lead = 1
    for d in shape[:-2]:
        lead *= d
    return lead * _rup(shape[-2], 8) * _rup(shape[-1], 128) * itemsize


def _vmem_capacity_bytes():
    try:
        cap = getattr(pltpu.get_tpu_info(), "vmem_capacity_bytes", None)
        if cap:
            return int(cap)
    except Exception:
        pass
    return 64 * 1024 * 1024   # conservative default (v7x per-TensorCore)


def multi_head_attention(qry, key, val, wq, wk, wv, wo, bo,
                         *, n_head, d_head, q_tile=None):
    """qry: (B, Nq, Dq), key: (B, Nk, Dk), val: (B, Nk, Dv).
    wq/wk/wv: (D*, n_head*d_head) stored so that y = x @ W (i.e. the transpose
    of the PyTorch nn.Linear weight). wo: (n_head*d_head, Dq), bo: (Dq,)."""
    B, Nq, Dq = qry.shape
    _, Nk, Dk = key.shape
    _, _, Dv = val.shape
    Dh = n_head * d_head
    assert wq.shape == (Dq, Dh) and wk.shape == (Dk, Dh) and wv.shape == (Dv, Dh)
    assert wo.shape == (Dh, Dq) and bo.shape == (Dq,)

    cdt = qry.dtype                       # compute dtype for MXU operands
    act_bytes = jnp.dtype(cdt).itemsize
    min_rows = 16 if act_bytes < 4 else 8   # bf16 packs 16 sublanes per vreg

    vmem_cap = _vmem_capacity_bytes()
    budget = int(0.75 * vmem_cap)

    def est(tq):
        # double-buffered pipeline blocks (qry, out, key, val, weights, bias)
        blocks = 2 * (2 * _padded_bytes((tq, Dq), act_bytes)
                      + _padded_bytes((Nk, Dk), act_bytes)
                      + _padded_bytes((Nk, Dv), act_bytes)
                      + _padded_bytes((Dq, Dh), act_bytes)
                      + _padded_bytes((Dk, Dh), act_bytes)
                      + _padded_bytes((Dv, Dh), act_bytes)
                      + _padded_bytes((Dh, Dq), act_bytes)
                      + _padded_bytes((1, Dq), act_bytes))
        # per-head K/V scratch (minor dim padded to 128 lanes)
        scratch = 2 * _padded_bytes((Nk, n_head, d_head), act_bytes)
        # f32 in-kernel temporaries (sim, p, attn@V result, q proj, y)
        temps = 4 * (2 * n_head * tq * _rup(Nk, 128)
                     + n_head * tq * _rup(d_head, 128)
                     + tq * _rup(Dh, 128)
                     + tq * _rup(Dq, 128))
        return blocks + scratch + temps

    if q_tile is None:
        if Nq >= 256:
            gran = 256                     # fill the 2x256^2 MXU on v6e/v7x
        elif Nq >= 128:
            gran = 128
        else:
            gran = _rup(Nq, min_rows)      # single (padded) tile, no tiny tiles
        q_tile = min(_rup(Nq, gran), _rup(1024, gran))
        while q_tile > gran and est(q_tile) > budget:
            q_tile -= gran
    else:
        assert q_tile % min_rows == 0, (q_tile, min_rows)

    Nq_pad = _rup(Nq, q_tile)
    n_qt = Nq_pad // q_tile

    # Recover the second TensorCore (v7x) when there is no batch parallelism.
    core_split = 2 if (B == 1 and n_qt >= 2 and n_qt % 2 == 0) else 1
    qt_per_split = n_qt // core_split

    if Nq_pad != Nq:
        # Padded query rows are zeros -> finite outputs; sliced off below.
        qry = jnp.pad(qry, ((0, 0), (0, Nq_pad - Nq), (0, 0)))

    vmem_limit = min(max(int(1.25 * est(q_tile)), 32 * 1024 * 1024), vmem_cap)

    scale_inv = 1.0 / (float(d_head) ** 0.5)
    kernel = functools.partial(_mha_kernel, n_head=n_head, d_head=d_head,
                               scale_inv=scale_inv)

    out = pl.pallas_call(
        kernel,
        out_shape=jax.ShapeDtypeStruct((B, Nq_pad, Dq), qry.dtype),
        grid_spec=pltpu.PrefetchScalarGridSpec(
            num_scalar_prefetch=0,
            grid=(B, core_split, qt_per_split),
            in_specs=[
                pl.BlockSpec((1, q_tile, Dq),
                             lambda b, s, t: (b, s * qt_per_split + t, 0)),   # qry
                pl.BlockSpec((1, Nk, Dk), lambda b, s, t: (b, 0, 0)),         # key
                pl.BlockSpec((1, Nk, Dv), lambda b, s, t: (b, 0, 0)),         # val
                pl.BlockSpec((Dq, Dh), lambda b, s, t: (0, 0)),               # wq
                pl.BlockSpec((Dk, Dh), lambda b, s, t: (0, 0)),               # wk
                pl.BlockSpec((Dv, Dh), lambda b, s, t: (0, 0)),               # wv
                pl.BlockSpec((Dh, Dq), lambda b, s, t: (0, 0)),               # wo
                pl.BlockSpec((1, Dq), lambda b, s, t: (0, 0)),                # bias
            ],
            out_specs=pl.BlockSpec((1, q_tile, Dq),
                                   lambda b, s, t: (b, s * qt_per_split + t, 0)),
            scratch_shapes=[pltpu.VMEM((Nk, n_head, d_head), cdt),
                            pltpu.VMEM((Nk, n_head, d_head), cdt)],
        ),
        compiler_params=pltpu.CompilerParams(
            # batch + core-split are parallel (megacore); the query-tile axis
            # must stay in-order on a core because the K/V scratch is filled
            # at query-tile index 0.
            dimension_semantics=("parallel", "parallel", "arbitrary"),
            vmem_limit_bytes=vmem_limit),
    )(qry, key, val, wq, wk, wv, wo, bo.reshape(1, Dq))

    if Nq_pad != Nq:
        out = out[:, :Nq, :]
    return out


def multi_head_attention_ref(qry, key, val, wq, wk, wv, wo, bo,
                             *, n_head, d_head):
    """Pure-JAX reference mirroring the PyTorch forward (mask=None)."""
    B, Nq, _ = qry.shape
    _, Nk, _ = key.shape
    q = qry @ wq
    k = key @ wk
    v = val @ wv

    def split(t, n):   # 'b n (h d) -> b h n d'
        return t.reshape(B, n, n_head, d_head).transpose(0, 2, 1, 3)

    q, k, v = split(q, Nq), split(k, Nk), split(v, Nk)
    sim = jnp.einsum('bhid,bhjd->bhij', q, k) / (d_head ** 0.5)
    attn = jax.nn.softmax(sim, axis=-1)
    out = jnp.einsum('bhij,bhjd->bhid', attn, v)
    out = out.transpose(0, 2, 1, 3).reshape(B, Nq, n_head * d_head)
    return out @ wo + bo


if __name__ == "__main__":
    # small cross-attention shapes consistent with the module's forward
    B = 2
    Nq, Nk = 16, 8
    d_qry, d_key, d_val = 32, 48, 40
    n_head, d_head = 4, 16
    d_hidden = n_head * d_head

    root = jax.random.PRNGKey(0)
    kq, kk, kv, k1, k2, k3, k4, k5 = jax.random.split(root, 8)

    qry = jax.random.normal(kq, (B, Nq, d_qry), dtype=jnp.float32)
    key = jax.random.normal(kk, (B, Nk, d_key), dtype=jnp.float32)
    val = jax.random.normal(kv, (B, Nk, d_val), dtype=jnp.float32)

    # nn.Linear(d_in, d_out) weight is (d_out, d_in); we store W = weight.T so
    # that y = x @ W, which is what the kernel consumes.
    wq = jax.random.normal(k1, (d_qry, d_hidden), dtype=jnp.float32) * 0.1
    wk = jax.random.normal(k2, (d_key, d_hidden), dtype=jnp.float32) * 0.1
    wv = jax.random.normal(k3, (d_val, d_hidden), dtype=jnp.float32) * 0.1
    wo = jax.random.normal(k4, (d_hidden, d_qry), dtype=jnp.float32) * 0.1
    bo = jax.random.normal(k5, (d_qry,), dtype=jnp.float32) * 0.1

    ref = multi_head_attention_ref(qry, key, val, wq, wk, wv, wo, bo,
                                   n_head=n_head, d_head=d_head)

    # f32 path; q_tile=8 exercises query tiling + K/V-scratch reuse across tiles.
    out = multi_head_attention(qry, key, val, wq, wk, wv, wo, bo,
                               n_head=n_head, d_head=d_head, q_tile=8)
    out = jax.block_until_ready(out)
    assert out.shape == (B, Nq, d_qry)
    assert jnp.allclose(out, ref, atol=2e-3, rtol=2e-3), (
        float(jnp.max(jnp.abs(out - ref))))

    # bf16-on-MXU fast path (v6e/v7x); softmax + accumulation stay in f32.
    bf = lambda t: t.astype(jnp.bfloat16)
    out_bf16 = multi_head_attention(bf(qry), bf(key), bf(val),
                                    bf(wq), bf(wk), bf(wv), bf(wo), bf(bo),
                                    n_head=n_head, d_head=d_head)
    out_bf16 = jax.block_until_ready(out_bf16)
    assert out_bf16.shape == (B, Nq, d_qry)
    assert jnp.allclose(out_bf16.astype(jnp.float32), ref,
                        atol=0.15, rtol=0.15), (
        float(jnp.max(jnp.abs(out_bf16.astype(jnp.float32) - ref))))

    # B=1 with a non-multiple Nq: exercises query padding + output slicing and
    # the core-split ("parallel") axis that feeds v7x's second TensorCore.
    Nq1 = 12
    qry1, key1, val1 = qry[:1, :Nq1], key[:1], val[:1]
    ref1 = multi_head_attention_ref(qry1, key1, val1, wq, wk, wv, wo, bo,
                                    n_head=n_head, d_head=d_head)
    out1 = multi_head_attention(qry1, key1, val1, wq, wk, wv, wo, bo,
                                n_head=n_head, d_head=d_head, q_tile=8)
    out1 = jax.block_until_ready(out1)
    assert out1.shape == (1, Nq1, d_qry)
    assert jnp.allclose(out1, ref1, atol=2e-3, rtol=2e-3), (
        float(jnp.max(jnp.abs(out1 - ref1))))

    print("KERNEL_OK")
</pallas_src>

<mosaic_0001>
module attributes {stable_mosaic.version = 11 : i64} {
  func.func @_mha_kernel(%arg0: i32, %arg1: i32, %arg2: i32, %arg3: memref<1x8x32xf32, #tpu.memory_space<vmem>>, %arg4: memref<1x8x48xf32, #tpu.memory_space<vmem>>, %arg5: memref<1x8x40xf32, #tpu.memory_space<vmem>>, %arg6: memref<32x64xf32, #tpu.memory_space<vmem>>, %arg7: memref<48x64xf32, #tpu.memory_space<vmem>>, %arg8: memref<40x64xf32, #tpu.memory_space<vmem>>, %arg9: memref<64x32xf32, #tpu.memory_space<vmem>>, %arg10: memref<1x32xf32, #tpu.memory_space<vmem>>, %arg11: memref<1x8x32xf32, #tpu.memory_space<vmem>>, %arg12: memref<8x4x16xf32, #tpu.memory_space<vmem>>, %arg13: memref<8x4x16xf32, #tpu.memory_space<vmem>>) attributes {dimension_semantics = [#tpu.dimension_semantics<parallel>, #tpu.dimension_semantics<parallel>, #tpu.dimension_semantics<arbitrary>], iteration_bounds = array<i64: 2, 1, 2>, scalar_prefetch = 0 : i64, scratch_operands = 2 : i64, tpu.core_type = #tpu.core_type<tc>, window_params = [{transform_indices = @transform_0, window_bounds = array<i64: 1, 8, 32>}, {transform_indices = @transform_1, window_bounds = array<i64: 1, 8, 48>}, {transform_indices = @transform_2, window_bounds = array<i64: 1, 8, 40>}, {pipeline_mode = #tpu.pipeline_mode<synchronous>, transform_indices = @transform_3, window_bounds = array<i64: 32, 64>}, {pipeline_mode = #tpu.pipeline_mode<synchronous>, transform_indices = @transform_4, window_bounds = array<i64: 48, 64>}, {pipeline_mode = #tpu.pipeline_mode<synchronous>, transform_indices = @transform_5, window_bounds = array<i64: 40, 64>}, {pipeline_mode = #tpu.pipeline_mode<synchronous>, transform_indices = @transform_6, window_bounds = array<i64: 64, 32>}, {pipeline_mode = #tpu.pipeline_mode<synchronous>, transform_indices = @transform_7, window_bounds = array<i64: 1, 32>}, {transform_indices = @transform_8, window_bounds = array<i64: 1, 8, 32>}]} {
    %c0_i32 = arith.constant 0 : i32
    %0 = arith.cmpi eq, %arg2, %c0_i32 : i32
    %1 = arith.extui %0 : i1 to i32
    %c0_i32_0 = arith.constant 0 : i32
    %2 = arith.cmpi ne, %1, %c0_i32_0 : i32
    scf.if %2 {
      %c0_24 = arith.constant 0 : index
      %c0_25 = arith.constant 0 : index
      %c0_26 = arith.constant 0 : index
      %34 = vector.load %arg4[%c0_24, %c0_25, %c0_26] : memref<1x8x48xf32, #tpu.memory_space<vmem>>, vector<1x8x48xf32>
      %35 = vector.shape_cast %34 : vector<1x8x48xf32> to vector<8x48xf32>
      %c0_27 = arith.constant 0 : index
      %c0_28 = arith.constant 0 : index
      %36 = vector.load %arg7[%c0_27, %c0_28] : memref<48x64xf32, #tpu.memory_space<vmem>>, vector<48x64xf32>
      %cst_29 = arith.constant dense<0.000000e+00> : vector<8x64xf32>
      %37 = tpu.matmul %35, %36, %cst_29 {dimension_numbers = #tpu.dot_dimension_numbers<[1], [0], [0], [1], [0, 0, 1, 1], [], []>} : vector<8x48xf32>, vector<48x64xf32>, vector<8x64xf32> -> vector<8x64xf32>
      %c0_30 = arith.constant 0 : index
      %c0_31 = arith.constant 0 : index
      %c0_32 = arith.constant 0 : index
      %38 = vector.load %arg5[%c0_30, %c0_31, %c0_32] : memref<1x8x40xf32, #tpu.memory_space<vmem>>, vector<1x8x40xf32>
      %39 = vector.shape_cast %38 : vector<1x8x40xf32> to vector<8x40xf32>
      %c0_33 = arith.constant 0 : index
      %c0_34 = arith.constant 0 : index
      %40 = vector.load %arg8[%c0_33, %c0_34] : memref<40x64xf32, #tpu.memory_space<vmem>>, vector<40x64xf32>
      %cst_35 = arith.constant dense<0.000000e+00> : vector<8x64xf32>
      %41 = tpu.matmul %39, %40, %cst_35 {dimension_numbers = #tpu.dot_dimension_numbers<[1], [0], [0], [1], [0, 0, 1, 1], [], []>} : vector<8x40xf32>, vector<40x64xf32>, vector<8x64xf32> -> vector<8x64xf32>
      %42 = vector.shape_cast %37 : vector<8x64xf32> to vector<8x4x16xf32>
      %c0_36 = arith.constant 0 : index
      %c0_37 = arith.constant 0 : index
      %c0_38 = arith.constant 0 : index
      %43 = vector.load %arg12[%c0_36, %c0_37, %c0_38] : memref<8x4x16xf32, #tpu.memory_space<vmem>>, vector<8x4x16xf32>
      tpu.vector_store %arg12[%c0_36, %c0_37, %c0_38], %42 {strides = array<i32>} : memref<8x4x16xf32, #tpu.memory_space<vmem>>, vector<8x4x16xf32>,
      %44 = vector.shape_cast %41 : vector<8x64xf32> to vector<8x4x16xf32>
      %c0_39 = arith.constant 0 : index
      %c0_40 = arith.constant 0 : index
      %c0_41 = arith.constant 0 : index
      %45 = vector.load %arg13[%c0_39, %c0_40, %c0_41] : memref<8x4x16xf32, #tpu.memory_space<vmem>>, vector<8x4x16xf32>
      tpu.vector_store %arg13[%c0_39, %c0_40, %c0_41], %44 {strides = array<i32>} : memref<8x4x16xf32, #tpu.memory_space<vmem>>, vector<8x4x16xf32>,
    } else {
    }
    %c0 = arith.constant 0 : index
    %c0_1 = arith.constant 0 : index
    %c0_2 = arith.constant 0 : index
    %3 = vector.load %arg3[%c0, %c0_1, %c0_2] : memref<1x8x32xf32, #tpu.memory_space<vmem>>, vector<1x8x32xf32>
    %4 = vector.shape_cast %3 : vector<1x8x32xf32> to vector<8x32xf32>
    %c0_3 = arith.constant 0 : index
    %c0_4 = arith.constant 0 : index
    %5 = vector.load %arg6[%c0_3, %c0_4] : memref<32x64xf32, #tpu.memory_space<vmem>>, vector<32x64xf32>
    %cst = arith.constant dense<0.000000e+00> : vector<8x64xf32>
    %6 = tpu.matmul %4, %5, %cst {dimension_numbers = #tpu.dot_dimension_numbers<[1], [0], [0], [1], [0, 0, 1, 1], [], []>} : vector<8x32xf32>, vector<32x64xf32>, vector<8x64xf32> -> vector<8x64xf32>
    %cst_5 = arith.constant 2.500000e-01 : f32
    %7 = vector.broadcast %cst_5 : f32 to vector<8x64xf32>
    %8 = arith.mulf %6, %7 : vector<8x64xf32>
    %9 = vector.shape_cast %8 : vector<8x64xf32> to vector<8x4x16xf32>
    %c0_6 = arith.constant 0 : index
    %c0_7 = arith.constant 0 : index
    %c0_8 = arith.constant 0 : index
    %10 = vector.load %arg12[%c0_6, %c0_7, %c0_8] : memref<8x4x16xf32, #tpu.memory_space<vmem>>, vector<8x4x16xf32>
    %cst_9 = arith.constant dense<0.000000e+00> : vector<4x8x8xf32>
    %11 = tpu.matmul %9, %10, %cst_9 {dimension_numbers = #tpu.dot_dimension_numbers<[2], [2], [0], [0], [0, 1, 0, 0, 1, 0], [1], [1]>} : vector<8x4x16xf32>, vector<8x4x16xf32>, vector<4x8x8xf32> -> vector<4x8x8xf32>
    %cst_10 = arith.constant dense<0xFF800000> : vector<4x8xf32>
    %12 = vector.multi_reduction <maximumf>, %11, %cst_10 [2] : vector<4x8x8xf32> to vector<4x8xf32>
    %13 = vector.shape_cast %12 : vector<4x8xf32> to vector<4x8x1xf32>
    %14 = vector.broadcast %13 : vector<4x8x1xf32> to vector<4x8x8xf32>
    %15 = arith.subf %11, %14 : vector<4x8x8xf32>
    %16 = math.exp %15 : vector<4x8x8xf32>
    %cst_11 = arith.constant dense<0.000000e+00> : vector<4x8xf32>
    %17 = vector.multi_reduction <add>, %16, %cst_11 [2] : vector<4x8x8xf32> to vector<4x8xf32>
    %18 = vector.shape_cast %17 : vector<4x8xf32> to vector<4x8x1xf32>
    %c0_12 = arith.constant 0 : index
    %c0_13 = arith.constant 0 : index
    %c0_14 = arith.constant 0 : index
    %19 = vector.load %arg13[%c0_12, %c0_13, %c0_14] : memref<8x4x16xf32, #tpu.memory_space<vmem>>, vector<8x4x16xf32>
    %cst_15 = arith.constant dense<0.000000e+00> : vector<4x8x16xf32>
    %20 = tpu.matmul %16, %19, %cst_15 {dimension_numbers = #tpu.dot_dimension_numbers<[2], [0], [1], [2], [0, 0, 0, 1, 1, 2], [0], [1]>} : vector<4x8x8xf32>, vector<8x4x16xf32>, vector<4x8x16xf32> -> vector<4x8x16xf32>
    %21 = tpu.reciprocal %18 {approx = true} : vector<4x8x1xf32> -> vector<4x8x1xf32>
    %22 = vector.broadcast %21 : vector<4x8x1xf32> to vector<4x8x16xf32>
    %23 = arith.mulf %20, %22 : vector<4x8x16xf32>
    %24 = tpu.transpose %23, [1, 0, 2] : vector<4x8x16xf32> -> vector<8x4x16xf32>
    %25 = vector.shape_cast %24 : vector<8x4x16xf32> to vector<8x64xf32>
    %c0_16 = arith.constant 0 : index
    %c0_17 = arith.constant 0 : index
    %26 = vector.load %arg9[%c0_16, %c0_17] : memref<64x32xf32, #tpu.memory_space<vmem>>, vector<64x32xf32>
    %cst_18 = arith.constant dense<0.000000e+00> : vector<8x32xf32>
    %27 = tpu.matmul %25, %26, %cst_18 {dimension_numbers = #tpu.dot_dimension_numbers<[1], [0], [0], [1], [0, 0, 1, 1], [], []>} : vector<8x64xf32>, vector<64x32xf32>, vector<8x32xf32> -> vector<8x32xf32>
    %c0_19 = arith.constant 0 : index
    %c0_20 = arith.constant 0 : index
    %28 = vector.load %arg10[%c0_19, %c0_20] : memref<1x32xf32, #tpu.memory_space<vmem>>, vector<1x32xf32>
    %29 = vector.broadcast %28 : vector<1x32xf32> to vector<8x32xf32>
    %30 = arith.addf %27, %29 : vector<8x32xf32>
    %c0_21 = arith.constant 0 : index
    %c0_22 = arith.constant 0 : index
    %c0_23 = arith.constant 0 : index
    %31 = vector.load %arg11[%c0_21, %c0_22, %c0_23] : memref<1x8x32xf32, #tpu.memory_space<vmem>>, vector<1x8x32xf32>
    %32 = vector.shape_cast %31 : vector<1x8x32xf32> to vector<8x32xf32>
    %33 = vector.shape_cast %30 : vector<8x32xf32> to vector<1x8x32xf32>
    tpu.vector_store %arg11[%c0_21, %c0_22, %c0_23], %33 {strides = array<i32>} : memref<1x8x32xf32, #tpu.memory_space<vmem>>, vector<1x8x32xf32>,
    return
  }
  func.func @transform_0(%arg0: i32, %arg1: i32, %arg2: i32) -> (i32, i32, i32) {
    %c2_i32 = arith.constant 2 : i32
    %0 = arith.muli %arg1, %c2_i32 : i32
    %1 = arith.addi %0, %arg2 : i32
    %c0_i32 = arith.constant 0 : i32
    %c0_i32_0 = arith.constant 0 : i32
    return %arg0, %1, %c0_i32 : i32, i32, i32
  }
  func.func @transform_1(%arg0: i32, %arg1: i32, %arg2: i32) -> (i32, i32, i32) {
    %c0_i32 = arith.constant 0 : i32
    %c0_i32_0 = arith.constant 0 : i32
    %c0_i32_1 = arith.constant 0 : i32
    return %arg0, %c0_i32, %c0_i32_0 : i32, i32, i32
  }
  func.func @transform_2(%arg0: i32, %arg1: i32, %arg2: i32) -> (i32, i32, i32) {
    %c0_i32 = arith.constant 0 : i32
    %c0_i32_0 = arith.constant 0 : i32
    %c0_i32_1 = arith.constant 0 : i32
    return %arg0, %c0_i32, %c0_i32_0 : i32, i32, i32
  }
  func.func @transform_3(%arg0: i32, %arg1: i32, %arg2: i32) -> (i32, i32) {
    %c0_i32 = arith.constant 0 : i32
    %c0_i32_0 = arith.constant 0 : i32
    %c0_i32_1 = arith.constant 0 : i32
    return %c0_i32, %c0_i32_0 : i32, i32
  }
  func.func @transform_4(%arg0: i32, %arg1: i32, %arg2: i32) -> (i32, i32) {
    %c0_i32 = arith.constant 0 : i32
    %c0_i32_0 = arith.constant 0 : i32
    %c0_i32_1 = arith.constant 0 : i32
    return %c0_i32, %c0_i32_0 : i32, i32
  }
  func.func @transform_5(%arg0: i32, %arg1: i32, %arg2: i32) -> (i32, i32) {
    %c0_i32 = arith.constant 0 : i32
    %c0_i32_0 = arith.constant 0 : i32
    %c0_i32_1 = arith.constant 0 : i32
    return %c0_i32, %c0_i32_0 : i32, i32
  }
  func.func @transform_6(%arg0: i32, %arg1: i32, %arg2: i32) -> (i32, i32) {
    %c0_i32 = arith.constant 0 : i32
    %c0_i32_0 = arith.constant 0 : i32
    %c0_i32_1 = arith.constant 0 : i32
    return %c0_i32, %c0_i32_0 : i32, i32
  }
  func.func @transform_7(%arg0: i32, %arg1: i32, %arg2: i32) -> (i32, i32) {
    %c0_i32 = arith.constant 0 : i32
    %c0_i32_0 = arith.constant 0 : i32
    %c0_i32_1 = arith.constant 0 : i32
    return %c0_i32, %c0_i32_0 : i32, i32
  }
  func.func @transform_8(%arg0: i32, %arg1: i32, %arg2: i32) -> (i32, i32, i32) {
    %c2_i32 = arith.constant 2 : i32
    %0 = arith.muli %arg1, %c2_i32 : i32
    %1 = arith.addi %0, %arg2 : i32
    %c0_i32 = arith.constant 0 : i32
    %c0_i32_0 = arith.constant 0 : i32
    return %arg0, %1, %c0_i32 : i32, i32, i32
  }
}

</mosaic_0001>

<bundles_post_ra>
// kernel: tpu_custom_call.1
= control target key start
LH: loop header
LB: loop body
LE: loop exit
PB: predicated region body
PF: predicated region fallthrough
CT: control target
= control target key end

     0   :  { %s3665_s0 = inlined_call_operand.hbm [shape: f32[2,16,32], index: 0, kind: input, shape index: {}]   ;;  %s3666_s1 = inlined_call_operand.hbm [shape: f32[2,8,48], index: 1, kind: input, shape index: {}]   ;;  %s3667_s2 = inlined_call_operand.hbm [shape: f32[2,8,40], index: 2, kind: input, shape index: {}]   ;;  %s3668_s3 = inlined_call_operand.hbm [shape: f32[32,64], index: 3, kind: input, shape index: {}]   ;;  %s3669_s4 = inlined_call_operand.vmem [shape: f32[48,64], index: 4, kind: input, shape index: {}]   ;;  %s3670_s5 = inlined_call_operand.vmem [shape: f32[40,64], index: 5, kind: input, shape index: {}]   ;;  %s3671_s6 = inlined_call_operand.vmem [shape: f32[64,32], index: 6, kind: input, shape index: {}]   ;;  %s3672_s7 = inlined_call_operand.vmem [shape: f32[1,32], index: 7, kind: input, shape index: {}]   ;;  %s3673_s8 = inlined_call_operand.hbm [shape: f32[2,16,32], index: 8, kind: output, shape index: {}]  }
   0x1   :  { %3689 = sst [smem:[#allocation26_spill]] %s3666_s1 }
   0x2   :  { %3690 = sst [smem:[#allocation27_spill]] %s3667_s2 }
   0x3   :  { %3691 = sst [smem:[#allocation28_spill]] %s3668_s3 }
   0x4   :  { %3692 = sst [smem:[#allocation29_spill]] %s3669_s4 }
   0x5   :  { %3693 = sst [smem:[#allocation30_spill]] %s3670_s5 }
   0x6   :  { %3694 = sst [smem:[#allocation31_spill]] %s3671_s6 }
   0x7   :  { %3695 = sst [smem:[#allocation32_spill]] %s3672_s7 }
   0x8   :  { %3696 = sst [smem:[#allocation33_spill]] %s3673_s8 }
   0x9   :  { %13 = vsyncpa [#allocation5], 0 }
   0xa   :  { %15 = vsyncpa [#allocation5 + $0x1], 0 }
   0xb   :  { %16 = vsyncpa [#allocation8], 0 }
   0xc   :  { %18 = vsyncpa [#allocation8 + $0x1], 0 }
   0xd   :  { %19 = vsyncpa [#allocation11], 0 }
   0xe   :  { %20 = vsyncpa [#allocation6], 0 }
   0xf   :  { %22 = vsyncpa [#allocation6 + $0x1], 0  ;;  %s3046_s27 = smov 0   ;;  %s3048_s28 = smov 0  }
  0x10   :  { %s3050_s29 = smov 0   ;;  %s3052_s30 = smov 0  }
  0x11   :  { %s3054_s9 = smov 0   ;;  %s3056_s10 = smov 0  }
  0x12   :  { %s3058_s11 = smov 0   ;;  %s3060_s12 = smov 0  }
  0x13   :  { %s3062_s13 = smov 0   ;;  %s3064_s14 = smov 0  }
  0x14   :  { %s3066_s15 = smov 0  }
  0x15 LB: > { %3697 = sst [smem:[#allocation17_spill]] %s2947_s28  ;;  %s3100_s16 = sadd.s32 4294967295, %s2983_s15   ;;  %s2983_s15 = sphi %s3066_s15, %s28_s15   ;;  %s2979_s14 = sphi %s3064_s14, %s3746_s14   ;;  %s2975_s13 = sphi %s3062_s13, %s3745_s13   ;;  %s2971_s12 = sphi %s3060_s12, %s3744_s12   ;;  %s2967_s11 = sphi %s3058_s11, %s3743_s11   ;;  %s2963_s10 = sphi %s3056_s10, %s3742_s10   ;;  %s2959_s9 = sphi %s3054_s9, %s3741_s9   ;;  %s2955_s30 = sphi %s3052_s30, %s3740_s30   ;;  %s2951_s29 = sphi %s3050_s29, %s3739_s29   ;;  %s2947_s28 = sphi %s3048_s28, %s3738_s28   ;;  %s2943_s27 = sphi %s3046_s27, %s3734_s27  }
  0x16   : > { %3698 = sst [smem:[#allocation18_spill]] %s2955_s30  ;;  %p68_p0 = scmp.eq.s32.totalorder %s2983_s15, 0 }
  0x17   : > { %3699 = sst [smem:[#allocation19_spill]] %s2967_s11  ;;  %p3676_p1 = scmp.eq.s32.totalorder %s3100_s16, 0 }
  0x18   : > { %3700 = sst [smem:[#allocation20_spill]] %s2971_s12  ;;  %p93_p2 = scmp.ne.s32.totalorder %s2951_s29, %s2947_s28 }
  0x19   : > { %p99_p3 = scmp.ne.s32.totalorder %s2947_s28, %s2943_s27  ;;  %p3677_p6 = scmp.lt.s32.totalorder %s2983_s15, 4 }
  0x1a   : > { %p3110_p4 = por %p93_p2, %p68_p0  ;;  %s335_s20 = sand.u32 1, %s2983_s15  }
  0x1b   : > { %p3116_p5 = por %p99_p3, %p3676_p1  ;;  %s337_s21 = sand.u32 1, %s2951_s29  }
  0x1c   : > { %s3123_s22 = sshll.u32 %s337_s21, 3  ;;  %s2446_s23 = sshll.u32 %s2979_s14, 3 }
  0x1d   : > { %s3702_s19 = scalar_select %p3116_p5, 1, 0 }
  0x1e   : > { %s3704_s1 = sld [smem:[#allocation26_spill]]  ;;  %s339_s17 = scalar_lea.vmem [#allocation7], %s3123_s22 }
  0x1f   : > { %3703 = sst [smem:[#allocation21_spill]] %s3702_s19  ;;  %s347_s7 = sshll.u32 %s339_s17, 4  ;;  %s348_s7 = int_to_ptr.vmem [resolvable:$true] %s347_s7 }
  0x20   : > { %p3134_p7 = pnand %p3677_p6, %p3110_p4  ;;  %s3706_s2 = sld [smem:[#allocation27_spill]] }
  0x21   : > { %s3143_s24 = scalar_lea.sflag [#allocation8], %s335_s20  ;;  %p2439_p8 = scmp.ge.s32.totalorder %s2983_s15, 1 }
  0x22   : > { %p273_p9 = scmp.lt.s32.totalorder %s2983_s15, 5  ;;  %s3707_s3 = sld [smem:[#allocation28_spill]] }
  0x23   : > { %s2985_s20 = smov [#allocation10]   ;;  %s40_s21 = sadd.s32 1, %s2975_s13 }
  0x24   : > { %s343_s26 = scalar_lea.hbm %s3704_s1, %s2446_s23  ;;  %p3153_p10 = pnand %p2439_p8, %p273_p9 }
  0x25   : > { %s345_s27 = sshll.u32 %s343_s26, 4  ;;  %s2987_s26 = smov 8   ;;  %s346_s27 = int_to_ptr.hbm [resolvable:$true] %s345_s27 }
  0x26   : > { %s3141_s6 = scalar_lea.hbm %s3706_s2, %s2446_s23  ;;  %p2485_p11 = pneg %p3153_p10 }
  0x27   : > { %2495 = dma.hbm_to_vmem [thread:$0]  (!%p3134_p7), %s346_s27, 128, %s348_s7, %s3143_s24  }
  0x28   : > { %s284_s25 = sshll.u32 %s3707_s3, 4  ;;  %s286_s7 = sshll.u32 %s2985_s20, 4  ;;  %s285_s25 = int_to_ptr.hbm [resolvable:$true] %s284_s25  ;;  %s287_s7 = int_to_ptr.vmem [resolvable:$true] %s286_s7 }
  0x29   : > { %p2486_p12 = pnand %p2485_p11, %p3676_p1  ;;  %s2986_s23 = smov 128  }
  0x2a   : > { %s2438_s27 = sadd.s32 4294967294, %s2983_s15   ;;  %s47_s17 = sadd.s32 1, %s2979_s14 }
  0x2b   : > { %2488 = dma.hbm_to_vmem [thread:$0]  (!%p2486_p12), %s285_s25, 512, %s287_s7, [#allocation11], %s2986_s23, %s2986_s23, %s2987_s26  }
  0x2c   : > { %p41_p13 = scmp.ge.s32.totalorder %s40_s21, 2  ;;  %s60_s18 = sadd.s32 1, %s2963_s10 }
  0x2d   : > { %p67_p2 = scmp.ne.s32.totalorder %s2963_s10, %s2959_s9  ;;  %p73_p3 = scmp.ne.s32.totalorder %s2959_s9, %s2955_s30 }
  0x2e   : > { %s3748_s21 = smov (%p41_p13, %s40_s21), 0  ;;  %s3750_s17 = smov (!%p41_p13, %s47_s17), %s2979_s14 }
  0x2f   : > { %3709 = sst [smem:[#allocation22_spill]] %s3748_s21  ;;  %s56_s20 = ssub.s32 %s2975_s13, %s3748_s21 }
  0x30   : > { %p3176_p4 = por %p68_p0, %p67_p2  ;;  %p49_p8 = scmp.ge.s32.totalorder %s3750_s17, 2 }
  0x31   : > { %p3182_p9 = por %p3676_p1, %p73_p3  ;;  %p260_p11 = scmp.eq.s32.totalorder %s3100_s16, 3 }
  0x32   : > { %p266_p12 = scmp.eq.s32.totalorder %s2438_s27, 3  ;;  %s3752_s17 = smov (%p49_p8, %s3750_s17), 0 }
  0x33   : > { %3712 = sst [smem:[#allocation23_spill]] %s3752_s17  ;;  %p3189_p13 = por %p260_p11, %p67_p2 }
  0x34   : > { %p3193_p0 = por %p266_p12, %p73_p3  ;;  %s55_s1 = ssub.s32 %s2979_s14, %s3752_s17 }
  0x35   : > { %s3713_s23 = scalar_select %p3189_p13, 1, 0 }
  0x36   : > { %s3715_s26 = scalar_select %p3193_p0, 1, 0 }
  0x37   : > { %3714 = sst [smem:[#allocation24_spill]] %s3713_s23  ;;  %s312_s2 = sand.u32 1, %s2963_s10  }
  0x38   : > { %3716 = sst [smem:[#allocation25_spill]] %s3715_s26  ;;  %s57_s3 = sor.u32 %s56_s20, %s55_s1 }
  0x39   : > { %p84_p1 = scmp.eq.s32.totalorder %s55_s1, 0  ;;  %p58_p6 = scmp.eq.s32.totalorder %s57_s3, 0 }
  0x3a   : > { %s3717_s27 = sadd.s32 1, %s2951_s29  ;;  %s2442_s5 = sshll.u32 %s312_s2, 3 }
  0x3b   : > { %s3203_s21 = scalar_select %p84_p1, %s2951_s29, %s3717_s27  }
  0x3c   : > { %s3206_s30 = scalar_select %p58_p6, %s2963_s10, %s60_s18  }
  0x3d   : > { %s2443_s23 = sshll.u32 %s2979_s14, 1  ;;  %s316_s17 = scalar_lea.vmem [#allocation4], %s2442_s5 }
  0x3e   : > { %s322_s4 = sadd.s32 %s2975_s13, %s2443_s23  ;;  %s328_s11 = sshll.u32 %s316_s17, 4  ;;  %s329_s11 = int_to_ptr.vmem [resolvable:$true] %s328_s11 }
  0x3f   : > { %s2444_s26 = sshll.u32 %s322_s4, 3  ;;  %p3718_p1 = scmp.lt.s32.totalorder %s2983_s15, 4 }
  0x40   : > { %s324_s20 = scalar_lea.hbm %s3665_s0, %s2444_s26  ;;  %s364_s3 = sshll.u32 %s3141_s6, 4  ;;  %s365_s3 = int_to_ptr.hbm [resolvable:$true] %s364_s3 }
  0x41   : > { %s326_s1 = sshll.u32 %s324_s20, 4  ;;  %p2490_p2 = pnand %p3718_p1, %p3176_p4  ;;  %s327_s1 = int_to_ptr.hbm [resolvable:$true] %s326_s1 }
  0x42   : > { %s313_s18 = scalar_lea.sflag [#allocation5], %s312_s2  ;;  %s358_s23 = scalar_lea.vmem [#allocation9], %s3123_s22 }
  0x43   : > { %2492 = dma.hbm_to_vmem [thread:$0]  (!%p2490_p2), %s327_s1, 128, %s329_s11, %s313_s18  }
  0x44   : > { %s366_s27 = sshll.u32 %s358_s23, 4  ;;  %375 = sbr.rel (%p3153_p10) target bundleno = 1594 (0x63a), region = 52  ;;  %s367_s27 = int_to_ptr.vmem [resolvable:$true] %s366_s27 }
  0x45   : > { %2498 = dma.hbm_to_vmem [thread:$0]  (!%p3134_p7), %s365_s3, 128, %s367_s27, %s3143_s24  }
  0x46   : > { %s3225_s4 = sand.u32 (!%p3153_p10), 1, %s2959_s9  }
  0x47   : > { %s2450_s5 = sshll.u32 (!%p3153_p10), %s3225_s4, 3  ;;  %s378_s28 = scalar_lea.sflag (!%p3153_p10), [#allocation5], %s3225_s4 }
  0x48   : > { %s3229_s6 = scalar_lea.vmem (!%p3153_p10), [#allocation4], %s2450_s5 }
  0x49   : > { %2926 = dma.done.wait (%p3182_p9), %s378_s28, 128  }
  0x4a   : > { %2928 = vsyncadd (%p3182_p9), %s378_s28, 4294967168  ;;  %s3719_s2 = sld [smem:[#allocation17_spill]]  ;;  %s387_s11 = sand.u32 1, %s3100_s16  }
  0x4b   : > { %s388_s24 = scalar_lea.sflag [#allocation8], %s387_s11 }
  0x50   : > { %s389_s19 = sand.u32 1, %s3719_s2  }
  0x51   : > { %s3237_s22 = sshll.u32 %s389_s19, 3 }
  0x52   : > { %s391_s12 = scalar_lea.vmem [#allocation7], %s3237_s22 }
  0x53   : > { %2930 = dma.done.wait (%p3116_p5), %s388_s24, 256  }
  0x54   : > { %2932 = vsyncadd (%p3116_p5), %s388_s24, 4294967040  ;;  %s401_s17 = scalar_lea.vmem [#allocation9], %s3237_s22  ;;  %p3721_p6 = scmp.eq.s32.totalorder %s3100_s16, 0 }
  0x56   : > { %2934 = dma.done.wait (%p3721_p6), [#allocation11], 512   ;;  %p3722_p7 = pmov %p3721_p6 }
  0x57   : > { %s3249_s25 = scalar_lea.vmem [#allocation12], %s2450_s5  ;;  %s3723_s7 = sld [smem:[#allocation19_spill]] }
  0x58   : > { %2936 = vsyncadd (%p3722_p7), [#allocation11], 4294966784 }
  0x5d   : > { %p2455_p10 = scmp.ne.s32.totalorder %s3723_s7, 0 }
  0x5e   : > { %s3724_s1 = sld [smem:[#allocation29_spill]] (!%p2455_p10)  ;;  %s2988_s2 = smov (!%p2455_p10), 96  }
  0x5f   : > { %457 = sbr.rel (%p2455_p10) target bundleno = 384 (0x180), region = 72  ;;  %s3725_s23 = sld [smem:[#allocation30_spill]] (!%p2455_p10) }
  0x60   : > { %s2989_s8 = smov (!%p2455_p10), 80  }
  0x64   : > { %v464_v0 = vld [vmem:[%s3724_s1 + $0x28] sm:$0xff]  ;;  %v463_v2 = vld [vmem:[%s3724_s1 + $0x20] sm:$0xff]  ;;  %v462_v4 = vld [vmem:[%s3724_s1 + $0x18] sm:$0xff]  ;;  %vm495_vm0 = vcmask 326656   ;;  %vm465_vm1 = vcmask 392192   ;;  %vm530_vm2 = vcmask 1047556  }
  0x65   : > { %v494_v1 = vld [vmem:[%s3725_s23 + $0x20] sm:$0xff]  ;;  %479 = vmatpush.msra.mxu0 %v464_v0  ;;  %v493_v3 = vld [vmem:[%s3725_s23 + $0x18] sm:$0xff]  ;;  %v492_v5 = vld [vmem:[%s3725_s23 + $0x10] sm:$0xff]  ;;  %v2991_v16 = vmov 1983009808   ;;  %vm586_vm3 = vcmask 125952  }
  0x66   : > { %510 = vmatpush.msra.mxu1 %v494_v1  ;;  %v461_v6 = vld [vmem:[%s3724_s1 + $0x10] sm:$0xff]  ;;  %v491_v7 = vld [vmem:[%s3725_s23 + $0x8] sm:$0xff]  ;;  %v490_v9 = vld [vmem:[%s3725_s23] sm:$0xff]  ;;  %v535_v17 = vunpack.c.l.s4 %v2991_v16  ;;  %v2992_v30 = vmov 1934713408  }
  0x67   : > { %480 = vmatpush.msra.mxu0 %v463_v2  ;;  %v460_v8 = vld [vmem:[%s3724_s1 + $0x8] sm:$0xff]  ;;  %v459_v11 = vld [vmem:[%s3724_s1] sm:$0xff]  ;;  %v458_v12 = vld [vmem:[%s391_s12] sm:$0xff]  ;;  %v559_v31 = vunpack.c.l.s4 %v2992_v30 }
  0x68   : > { %511 = vmatpush.msra.mxu1 %v493_v3  ;;  %v489_v10 = vld [vmem:[%s401_s17] sm:$0xff]  ;;  %s2990_s17 = smov 112   ;;  %v536_v24 = vunpack.c.0.s8 %v535_v17 }
  0x69   : > { %481 = vmatpush.msra.mxu0 %v462_v4  ;;  %v560_v38 = vunpack.c.0.s8 %v559_v31 }
  0x6a   : > { %512 = vmatpush.msra.mxu1 %v492_v5 }
  0x6b   : > { %482 = vmatpush.msra.mxu0 %v461_v6 }
  0x6c   : > { %513 = vmatpush.msra.mxu1 %v491_v7 }
  0x6d   : > { %483 = vmatpush.msra.mxu0 %v460_v8 }
  0x6e   : > { %514 = vmatpush.msra.mxu1 %v490_v9 }
  0x6f   : > { %2457 = vmatmul.msk.f32.vlgmr.msra.gmra.mxu1 %vm495_vm0, %v489_v10  ;;  %484 = vmatpush.msra.mxu0 %v459_v11 }
  0x70   : > { %2456 = vmatmul.msk.f32.vlgmr.msra.gmra.mxu0 %vm465_vm1, %v458_v12 }
  0xec   : > { %v516_v13 = vpop.f32.mrf.mxu1 }
  0xed   : > { %599 = vrot.lane.b32.xlu2 %v516_v13, %s2988_s2  ;;  %v486_v14 = vpop.f32.mrf.mxu0  ;;  %v607_v21 = vrot.slane %v516_v13, 4 }
  0xee   : > { %526 = vrot.lane.b32.xlu1 %v486_v14, %s2989_s8  ;;  %520 = vrot.lane.b32.xlu0 %v486_v14, %s2990_s17  ;;  %v532_v34 = vrot.slane %v486_v14, 4 }
  0xf5   : > { %602 = vrot.lane.b32.xlu2 %v516_v13, %s2989_s8 }
  0xf6   : > { %596 = vrot.lane.b32.xlu1 %v516_v13, %s2990_s17  ;;  %523 = vrot.lane.b32.xlu0 %v486_v14, %s2988_s2 }
 0x147   : > { %v600_v15 = vpop.permute.xlu2 %599 }
 0x148   : > { %v605_v18 = vrot.slane %v600_v15, 4  ;;  %v608_v26 = vsel %vm530_vm2, %v600_v15, %v607_v21 }
 0x149   : > { %v616_v33 = vperm.slane %v608_v26, %v536_v24 }
 0x14a   : > { %v606_v25 = vsel %vm530_vm2, %v605_v18, %v516_v13 }
 0x14b   : > { %v612_v32 = vperm.slane %v606_v25, %v536_v24  ;;  %v643_v46 = vrot.slane %v616_v33, 4 }
 0x14d   : > { %v631_v45 = vrot.slane %v612_v32, 4 }
 0x14f   : > { %v603_v27 = vpop.permute.xlu2 %602 }
 0x150   : > { %v617_v35 = vrot.slane %v603_v27, 4 }
 0x160   : > { %v527_v19 = vpop.permute.xlu1 %526  ;;  %v521_v20 = vpop.permute.xlu0 %520 }
 0x161   : > { %v542_v22 = vrot.slane %v527_v19, 4  ;;  %v544_v23 = vrot.slane %v521_v20, 4 }
 0x163   : > { %v543_v28 = vsel %vm530_vm2, %v542_v22, %v521_v20  ;;  %v545_v29 = vsel %vm530_vm2, %v527_v19, %v544_v23 }
 0x164   : > { %v549_v36 = vperm.slane %v543_v28, %v536_v24  ;;  %v553_v37 = vperm.slane %v545_v29, %v536_v24 }
 0x166   : > { %v554_v49 = vrot.slane %v549_v36, 4  ;;  %v566_v50 = vrot.slane %v553_v37, 4 }
 0x168   : > { %v597_v39 = vpop.permute.xlu1 %596  ;;  %v524_v40 = vpop.permute.xlu0 %523 }
 0x169   : > { %v618_v41 = vsel %vm530_vm2, %v617_v35, %v597_v39  ;;  %v619_v42 = vrot.slane %v597_v39, 4  ;;  %v529_v43 = vrot.slane %v524_v40, 4  ;;  %v533_v44 = vsel %vm530_vm2, %v524_v40, %v532_v34 }
 0x16a   : > { %v624_v47 = vperm.slane %v618_v41, %v536_v24  ;;  %v541_v48 = vperm.slane %v533_v44, %v536_v24 }
 0x16b   : > { %v620_v51 = vsel %vm530_vm2, %v603_v27, %v619_v42  ;;  %v531_v52 = vsel %vm530_vm2, %v529_v43, %v486_v14 }
 0x16c   : > { %v628_v53 = vperm.slane %v620_v51, %v536_v24  ;;  %v629_v54 = vrot.slane %v624_v47, 4  ;;  %v632_v55 = vsel %vm530_vm2, %v624_v47, %v631_v45  ;;  %v537_v56 = vperm.slane %v531_v52, %v536_v24 }
 0x16d   : > { %v640_v57 = vperm.slane %v632_v55, %v560_v38  ;;  %v567_v58 = vsel %vm530_vm2, %v566_v50, %v541_v48  ;;  %v568_v59 = vrot.slane %v541_v48, 4 }
 0x16e   : > { %v630_v60 = vsel %vm530_vm2, %v629_v54, %v612_v32  ;;  %v641_v61 = vrot.slane %v628_v53, 4  ;;  %v644_v62 = vsel %vm530_vm2, %v628_v53, %v643_v46  ;;  %v555_v63 = vsel %vm530_vm2, %v554_v49, %v537_v56 }
 0x16f   : > { %v636_v0 = vperm.slane %v630_v60, %v560_v38  ;;  %v652_v1 = vperm.slane %v644_v62, %v560_v38  ;;  %v655_v2 = vrot.slane %v640_v57, 4  ;;  %663 = vst.msk [vmem:[#allocation3 + $0x8] sm:$0xf] %vm586_vm3, %v640_v57  ;;  %v556_v3 = vrot.slane %v537_v56, 4 }
 0x170   : > { %v642_v4 = vsel %vm530_vm2, %v641_v61, %v616_v33  ;;  %v561_v5 = vperm.slane %v555_v63, %v560_v38  ;;  %v569_v6 = vsel %vm530_vm2, %v553_v37, %v568_v59  ;;  %v573_v12 = vperm.slane %v567_v58, %v560_v38 }
 0x171   : > { %v648_v7 = vperm.slane %v642_v4, %v560_v38  ;;  %v653_v8 = vrot.slane %v636_v0, 4  ;;  %v656_v9 = vsel %vm530_vm2, 0.0, %v655_v2  ;;  %v659_v10 = vrot.slane %v652_v1, 4  ;;  %661 = vst.msk [vmem:[#allocation3] sm:$0xf] %vm586_vm3, %v636_v0 }
 0x172   : > { %664 = vst.msk [vmem:[#allocation3 + $0xc] sm:$0xf] %vm586_vm3, %v656_v9  ;;  %v557_v11 = vsel %vm530_vm2, %v549_v36, %v556_v3  ;;  %v578_v13 = vrot.slane %v561_v5, 4  ;;  %v577_v18 = vperm.slane %v569_v6, %v560_v38  ;;  %v582_v22 = vrot.slane %v573_v12, 4 }
 0x173   : > { %v654_v14 = vsel %vm530_vm2, 0.0, %v653_v8  ;;  %v657_v15 = vrot.slane %v648_v7, 4  ;;  %665 = vst.msk [vmem:[#allocation3 + $0x10] sm:$0xf] %vm586_vm3, %v648_v7  ;;  %v565_v16 = vperm.slane %v557_v11, %v560_v38  ;;  %v660_v17 = vsel %vm530_vm2, 0.0, %v659_v10 }
 0x174   : > { %662 = vst.msk [vmem:[#allocation3 + $0x4] sm:$0xf] %vm586_vm3, %v654_v14  ;;  %v579_v21 = vsel %vm530_vm2, 0.0, %v578_v13  ;;  %v584_v24 = vrot.slane %v577_v18, 4  ;;  %v583_v25 = vsel %vm530_vm2, 0.0, %v582_v22 }
 0x175   : > { %v658_v19 = vsel %vm530_vm2, 0.0, %v657_v15  ;;  %667 = vst.msk [vmem:[#allocation3 + $0x18] sm:$0xf] %vm586_vm3, %v652_v1  ;;  %v580_v20 = vrot.slane %v565_v16, 4 }
 0x176   : > { %666 = vst.msk [vmem:[#allocation3 + $0x14] sm:$0xf] %vm586_vm3, %v658_v19  ;;  %v585_v26 = vsel %vm530_vm2, 0.0, %v584_v24 }
 0x177   : > { %668 = vst.msk [vmem:[#allocation3 + $0x1c] sm:$0xf] %vm586_vm3, %v660_v17  ;;  %v581_v23 = vsel %vm530_vm2, 0.0, %v580_v20 }
 0x178   : > { %587 = vst.msk [vmem:[#allocation2] sm:$0xf] %vm586_vm3, %v561_v5 }
 0x179   : > { %588 = vst.msk [vmem:[#allocation2 + $0x4] sm:$0xf] %vm586_vm3, %v579_v21 }
 0x17a   : > { %589 = vst.msk [vmem:[#allocation2 + $0x8] sm:$0xf] %vm586_vm3, %v565_v16 }
 0x17b   : > { %590 = vst.msk [vmem:[#allocation2 + $0xc] sm:$0xf] %vm586_vm3, %v581_v23 }
 0x17c   : > { %591 = vst.msk [vmem:[#allocation2 + $0x10] sm:$0xf] %vm586_vm3, %v573_v12 }
 0x17d   : > { %592 = vst.msk [vmem:[#allocation2 + $0x14] sm:$0xf] %vm586_vm3, %v583_v25 }
 0x17e   : > { %593 = vst.msk [vmem:[#allocation2 + $0x18] sm:$0xf] %vm586_vm3, %v577_v18 }
 0x17f   : > { %594 = vst.msk [vmem:[#allocation2 + $0x1c] sm:$0xf] %vm586_vm3, %v585_v26 }
 0x180 PF: > { %v707_v27 = vld [vmem:[#allocation2 + $0x4] sm:$0xf]  ;;  %v706_v29 = vld [vmem:[#allocation2] sm:$0xf]  ;;  %v673_v39 = vld [vmem:[#allocation10 + $0x18] sm:$0xff]  ;;  %vm674_vm4 = vcmask 261120  }
 0x181   : > { %v708_v31 = vld [vmem:[#allocation2 + $0x8] sm:$0xf]  ;;  %690 = vmatpush.msra.mxu0 %v673_v39  ;;  %v672_v40 = vld [vmem:[#allocation10 + $0x10] sm:$0xff]  ;;  %v671_v41 = vld [vmem:[#allocation10 + $0x8] sm:$0xff]  ;;  %v2993_v48 = vmov 1983009808  }
 0x182   : > { %v2612_v32 = vpack.i.bf16 %v706_v29, %v708_v31  ;;  %v709_v35 = vld [vmem:[#allocation2 + $0xc] sm:$0xf]  ;;  %v670_v42 = vld [vmem:[#allocation10] sm:$0xff]  ;;  %v976_v49 = vunpack.c.l.s4 %v2993_v48  ;;  %vm971_vm5 = vcmask 1047556   ;;  %v2994_v58 = vmov 1934713408  }
 0x183   : > { %v710_v28 = vld [vmem:[#allocation2 + $0x10] sm:$0xf]  ;;  %691 = vmatpush.msra.mxu0 %v672_v40  ;;  %v669_v43 = vld [vmem:[%s3229_s6] sm:$0xff]  ;;  %v1024_v59 = vunpack.c.l.s4 %v2994_v58  ;;  %s2995_s6 = smov 96   ;;  %s2996_s22 = smov 112   ;;  %vm1819_vm6 = vcmask 130048  }
 0x184   : > { %v2636_v30 = vpack.i.bf16 %v710_v28, %v707_v27  ;;  %2613 = vxpose.xlu0.b32.start.end [1/1] (short) (narrow) %v2612_v32, 16  ;;  %v711_v33 = vld [vmem:[#allocation2 + $0x14] sm:$0xf]  ;;  %v3331_v60 = vunpack.c.0.s8 %v976_v49  ;;  %s2997_s12 = smov 80   ;;  %vm1908_vm7 = vcmask 64512   ;;  %s2998_s11 = smov 32  }
 0x185   : > { %v712_v36 = vld [vmem:[#allocation2 + $0x18] sm:$0xf]  ;;  %692 = vmatpush.msra.mxu0 %v671_v41  ;;  %v3335_v3 = vunpack.c.0.s8 %v1024_v59  ;;  %s2999_s19 = smov 48   ;;  %s3000_s24 = smov 16   ;;  %vm2233_vm8 = vcmask 392192   ;;  %vm2247_vm9 = vcmask 523264  }
 0x186   : > { %2637 = vxpose.xlu1.b32.start.end [1/1] (short) (narrow) %v2636_v30, 16  ;;  %v713_v34 = vld [vmem:[#allocation2 + $0x1c] sm:$0xf]  ;;  %v2624_v38 = vpack.i.bf16 %v712_v36, %v709_v35  ;;  %s3726_s20 = sld [smem:[#allocation31_spill]] }
 0x187   : > { %v2648_v37 = vpack.i.bf16 %v711_v33, %v713_v34  ;;  %693 = vmatpush.msra.mxu0 %v670_v42  ;;  %s3730_s5 = sld [smem:[#allocation33_spill]] }
 0x188   : > { %2458 = vmatmul.msk.f32.vlgmr.msra.gmra.mxu0 %vm674_vm4, %v669_v43 }
 0x194   : > { %2625 = vxpose.xlu0.b32.start.end [1/1] (short) (narrow) %v2624_v38, 16 }
 0x196   : > { %2649 = vxpose.xlu1.b32.start.end [1/1] (short) (narrow) %v2648_v37, 16 }
 0x228   : > { %v2614_v45 = vpop.trf.xlu0 }
 0x229   : > { %v2618_v46 = vunpack.i.h.bf16 %v2614_v45  ;;  %v2615_v47 = vunpack.i.l.bf16 %v2614_v45 }
 0x22a   : > { %v2638_v44 = vpop.trf.xlu1 }
 0x22b   : > { %v973_v51 = vrot.slane %v2618_v46, 4  ;;  %v970_v52 = vrot.slane %v2615_v47, 4  ;;  %v2642_v55 = vunpack.i.h.bf16 %v2638_v44  ;;  %v2639_v56 = vunpack.i.l.bf16 %v2638_v44 }
 0x22d   : > { %v972_v62 = vsel %vm971_vm5, %v970_v52, %v2618_v46  ;;  %v974_v63 = vsel %vm971_vm5, %v2615_v47, %v973_v51  ;;  %v997_v0 = vrot.slane %v2642_v55, 4  ;;  %v985_v1 = vrot.slane %v2639_v56, 4 }
 0x22e   : > { %v3338_v4 = vperm.slane %v972_v62, %v3331_v60  ;;  %v3341_v5 = vperm.slane %v974_v63, %v3331_v60 }
 0x230   : > { %v2619_v53 = vpop.trf.xlu0  ;;  %v1021_v28 = vrot.slane %v3338_v4, 4  ;;  %v1033_v29 = vrot.slane %v3341_v5, 4 }
 0x231   : > { %v2623_v54 = vunpack.i.h.bf16 %v2619_v53  ;;  %v2620_v57 = vunpack.i.l.bf16 %v2619_v53 }
 0x232   : > { %v3329_v50 = vpop.trf.xlu1 }
 0x233   : > { %v1085_v61 = vrot.slane %v2623_v54, 4  ;;  %v1083_v2 = vrot.slane %v2620_v57, 4  ;;  %v2647_v6 = vunpack.i.h.bf16 %v3329_v50  ;;  %v2644_v9 = vunpack.i.l.bf16 %v3329_v50 }
 0x235   : > { %v1086_v7 = vsel %vm971_vm5, %v2620_v57, %v1085_v61  ;;  %v1084_v14 = vsel %vm971_vm5, %v1083_v2, %v2623_v54  ;;  %v1109_v18 = vrot.slane %v2647_v6, 4  ;;  %v1097_v22 = vrot.slane %v2644_v9, 4 }
 0x236   : > { %v3348_v15 = vperm.slane %v1086_v7, %v3331_v60  ;;  %v1090_v26 = vperm.slane %v1084_v14, %v3331_v60 }
 0x238   : > { %v2626_v11 = vpop.trf.xlu0  ;;  %v1145_v30 = vrot.slane %v3348_v15, 4  ;;  %v1133_v47 = vrot.slane %v1090_v26, 4 }
 0x239   : > { %v2630_v13 = vunpack.i.h.bf16 %v2626_v11  ;;  %v2627_v17 = vunpack.i.l.bf16 %v2626_v11 }
 0x23a   : > { %v2650_v8 = vpop.trf.xlu1 }
 0x23b   : > { %v2654_v10 = vunpack.i.h.bf16 %v2650_v8  ;;  %v2651_v12 = vunpack.i.l.bf16 %v2650_v8  ;;  %v995_v20 = vrot.slane %v2630_v13, 4  ;;  %v998_v21 = vsel %vm971_vm5, %v2630_v13, %v997_v0 }
 0x23c   : > { %v983_v24 = vrot.slane %v2627_v17, 4  ;;  %v986_v25 = vsel %vm971_vm5, %v2627_v17, %v985_v1  ;;  %v3359_v31 = vperm.slane %v998_v21, %v3331_v60 }
 0x23d   : > { %v1009_v16 = vrot.slane %v2654_v10, 4  ;;  %v1007_v19 = vrot.slane %v2651_v12, 4  ;;  %v996_v27 = vsel %vm971_vm5, %v995_v20, %v2642_v55  ;;  %v3368_v36 = vperm.slane %v986_v25, %v3331_v60 }
 0x23e   : > { %v984_v32 = vsel %vm971_vm5, %v983_v24, %v2639_v56  ;;  %v1002_v33 = vperm.slane %v996_v27, %v3331_v60  ;;  %v1057_v48 = vrot.slane %v3359_v31, 4 }
 0x23f   : > { %v1010_v23 = vsel %vm971_vm5, %v2651_v12, %v1009_v16  ;;  %v1008_v34 = vsel %vm971_vm5, %v1007_v19, %v2654_v10  ;;  %v990_v38 = vperm.slane %v984_v32, %v3331_v60  ;;  %v1031_v52 = vrot.slane %v3368_v36, 4 }
 0x240   : > { %v3365_v35 = vperm.slane %v1010_v23, %v3331_v60  ;;  %v2631_v41 = vpop.trf.xlu0  ;;  %v1045_v46 = vrot.slane %v1002_v33, 4  ;;  %v1014_v51 = vperm.slane %v1008_v34, %v3331_v60 }
 0x241   : > { %v2635_v42 = vunpack.i.h.bf16 %v2631_v41  ;;  %v2632_v43 = vunpack.i.l.bf16 %v2631_v41  ;;  %v1022_v45 = vsel %vm971_vm5, %v990_v38, %v1021_v28 }
 0x242   : > { %v2655_v37 = vpop.trf.xlu1  ;;  %v1055_v55 = vrot.slane %v3365_v35, 4  ;;  %v3381_v59 = vperm.slane %v1022_v45, %v3335_v3  ;;  %v1046_v62 = vsel %vm971_vm5, %v1014_v51, %v1045_v46  ;;  %v1043_v20 = vrot.slane %v1014_v51, 4 }
 0x243   : > { %v2659_v39 = vunpack.i.h.bf16 %v2655_v37  ;;  %v2656_v40 = vunpack.i.l.bf16 %v2655_v37  ;;  %v1107_v49 = vrot.slane %v2635_v42, 4  ;;  %v1095_v50 = vrot.slane %v2632_v43, 4 }
 0x244   : > { %v1098_v54 = vsel %vm971_vm5, %v2632_v43, %v1097_v22  ;;  %v1110_v61 = vsel %vm971_vm5, %v2635_v42, %v1109_v18  ;;  %v1054_v2 = vperm.slane %v1046_v62, %v3335_v3  ;;  %v1073_v8 = vrot.slane %v3381_v59, 4 }
 0x245   : > { %v1119_v44 = vrot.slane %v2656_v40, 4  ;;  %v1121_v56 = vrot.slane %v2659_v39, 4  ;;  %v1108_v57 = vsel %vm971_vm5, %v1107_v49, %v2647_v6  ;;  %v1096_v58 = vsel %vm971_vm5, %v1095_v50, %v2644_v9 }
 0x246   : > { %v1102_v63 = vperm.slane %v1096_v58, %v3331_v60  ;;  %v1114_v0 = vperm.slane %v1108_v57, %v3331_v60  ;;  %v1106_v1 = vperm.slane %v1098_v54, %v3331_v60  ;;  %v1019_v6 = vrot.slane %v990_v38, 4 }
 0x247   : > { %v1120_v53 = vsel %vm971_vm5, %v1119_v44, %v2659_v39  ;;  %v1122_v12 = vsel %vm971_vm5, %v2656_v40, %v1121_v56  ;;  %v1118_v13 = vperm.slane %v1110_v61, %v3331_v60  ;;  %v1074_v27 = vsel %vm971_vm5, %v1054_v2, %v1073_v8 }
 0x248   : > { %v1126_v7 = vperm.slane %v1120_v53, %v3331_v60  ;;  %v1134_v9 = vsel %vm971_vm5, %v1102_v63, %v1133_v47  ;;  %v1157_v10 = vrot.slane %v1114_v0, 4  ;;  %v1131_v11 = vrot.slane %v1102_v63, 4 }
 0x249   : > { %v1142_v14 = vperm.slane %v1134_v9, %v3335_v3  ;;  %v1020_v19 = vsel %vm971_vm5, %v1019_v6, %v3338_v4  ;;  %v1130_v25 = vperm.slane %v1122_v12, %v3331_v60  ;;  %v1146_v32 = vsel %vm971_vm5, %v1106_v1, %v1145_v30 }
 0x24a   : > { %v1155_v16 = vrot.slane %v1126_v7, 4  ;;  %v1158_v17 = vsel %vm971_vm5, %v1126_v7, %v1157_v10  ;;  %v1132_v18 = vsel %vm971_vm5, %v1131_v11, %v1090_v26  ;;  %v1154_v37 = vperm.slane %v1146_v32, %v3335_v3 }
 0x24b   : > { %v1166_v21 = vperm.slane %v1158_v17, %v3335_v3  ;;  %v1185_v22 = vrot.slane %v1142_v14, 4  ;;  %v1138_v23 = vperm.slane %v1132_v18, %v3335_v3  ;;  %v1026_v39 = vperm.slane %v1020_v19, %v3335_v3 }
 0x24c   : > { %v1156_v24 = vsel %vm971_vm5, %v1155_v16, %v1114_v0  ;;  %v1044_v40 = vsel %vm971_vm5, %v1043_v20, %v1002_v33  ;;  %v1169_v41 = vrot.slane %v1118_v13, 4  ;;  %v1143_v42 = vrot.slane %v1106_v1, 4 }
 0x24d   : > { %v1162_v28 = vperm.slane %v1156_v24, %v3335_v3  ;;  %v1186_v26 = vsel %vm971_vm5, %v1166_v21, %v1185_v22  ;;  %v1181_v34 = vrot.slane %v1138_v23, 4  ;;  %v1183_v4 = vrot.slane %v1166_v21, 4 }
 0x24e   : > { %v2660_v38 = vpack.i.bf16 %v1074_v27, %v1186_v26  ;;  %v1034_v30 = vsel %vm971_vm5, %v3368_v36, %v1033_v29  ;;  %v1170_v46 = vsel %vm971_vm5, %v1130_v25, %v1169_v41  ;;  %v1167_v47 = vrot.slane %v1130_v25, 4  ;;  %v695_v27 = vpop.f32.mrf.mxu0 }
 0x24f   : > { %v1182_v43 = vsel %vm971_vm5, %v1162_v28, %v1181_v34  ;;  %v1184_v44 = vsel %vm971_vm5, %v1183_v4, %v1142_v14  ;;  %v1071_v49 = vrot.slane %v1054_v2, 4  ;;  %v1050_v50 = vperm.slane %v1044_v40, %v3335_v3 }
 0x250   : > { %2661 = vxpose.xlu2.b32.start.end [1/1] (short) (narrow) %v2660_v38, 8  ;;  %v2667_v45 = vpack.i.bf16 %v1184_v44, %v1182_v43  ;;  %v1178_v33 = vperm.slane %v1170_v46, %v3335_v3  ;;  %v1193_v51 = vrot.slane %v1154_v37, 4  ;;  %v1069_v53 = vrot.slane %v1026_v39, 4 }
 0x251   : > { %v1168_v54 = vsel %vm971_vm5, %v1167_v47, %v1118_v13  ;;  %v1042_v56 = vperm.slane %v1034_v30, %v3335_v3  ;;  %v1056_v29 = vsel %vm971_vm5, %v1055_v55, %v3359_v31  ;;  %v1144_v57 = vsel %vm971_vm5, %v1143_v42, %v3348_v15 }
 0x252   : > { %2668 = vxpose.xlu1.b32.start.end [1/1] (short) (narrow) %v2667_v45, 8  ;;  %v1174_v58 = vperm.slane %v1168_v54, %v3335_v3  ;;  %v1032_v61 = vsel %vm971_vm5, %v1031_v52, %v3341_v5  ;;  %v1058_v62 = vsel %vm971_vm5, %v3365_v35, %v1057_v48  ;;  %v1062_v63 = vperm.slane %v1056_v29, %v3335_v3 }
 0x253   : > { %v1066_v0 = vperm.slane %v1058_v62, %v3335_v3  ;;  %v1194_v55 = vsel %vm971_vm5, %v1178_v33, %v1193_v51  ;;  %v1081_v1 = vrot.slane %v1042_v56, 4  ;;  %v1072_v15 = vsel %vm971_vm5, %v1071_v49, %v3381_v59 }
 0x254   : > { %v1067_v2 = vrot.slane %v1050_v50, 4  ;;  %v1070_v36 = vsel %vm971_vm5, %v1050_v50, %v1069_v53  ;;  %v1150_v5 = vperm.slane %v1144_v57, %v3335_v3  ;;  %v1038_v31 = vperm.slane %v1032_v61, %v3335_v3 }
 0x255   : > { %v1191_v52 = vrot.slane %v1178_v33, 4  ;;  %v1082_v35 = vsel %vm971_vm5, %v1066_v0, %v1081_v1  ;;  %v1075_v7 = vrot.slane %v1062_v63, 4  ;;  %v1187_v6 = vrot.slane %v1174_v58, 4 }
 0x256   : > { %v1068_v48 = vsel %vm971_vm5, %v1067_v2, %v1026_v39  ;;  %v2674_v8 = vpack.i.bf16 %v1070_v36, %v1194_v55  ;;  %v2681_v9 = vpack.i.bf16 %v1082_v35, %v1072_v15  ;;  %v1179_v11 = vrot.slane %v1162_v28, 4 }
 0x257   : > { %v1192_v10 = vsel %vm971_vm5, %v1191_v52, %v1154_v37  ;;  %v1076_v12 = vsel %vm971_vm5, %v1075_v7, %v1038_v31  ;;  %v1188_v13 = vsel %vm971_vm5, %v1187_v6, %v1150_v5  ;;  %v1189_v16 = vrot.slane %v1150_v5, 4 }
 0x258   : > { %v2695_v59 = vpack.i.bf16 %v1068_v48, %v1192_v10  ;;  %v2709_v14 = vpack.i.bf16 %v1076_v12, %v1188_v13  ;;  %v1180_v17 = vsel %vm971_vm5, %v1179_v11, %v1138_v23  ;;  %v1077_v20 = vrot.slane %v1038_v31, 4 }
 0x259   : > { %v1190_v18 = vsel %vm971_vm5, %v1174_v58, %v1189_v16  ;;  %v1079_v21 = vrot.slane %v1066_v0, 4  ;;  %v3451_v28 = vmul.f32 0.25, %v695_v27 }
 0x25a   : > { %2675 = vxpose.xlu1.b32.start.end [1/1] (short) (narrow) %v2674_v8, 8  ;;  %v2688_v19 = vpack.i.bf16 %v1190_v18, %v1180_v17  ;;  %v1078_v22 = vsel %vm971_vm5, %v1062_v63, %v1077_v20 }
 0x25b   : > { %v1080_v24 = vsel %vm971_vm5, %v1079_v21, %v1042_v56  ;;  %702 = vrot.lane.b32.xlu0 %v3451_v28, %s2995_s6  ;;  %s3731_s6 = sld [smem:[#allocation32_spill]] }
 0x25c   : > { %v2702_v25 = vpack.i.bf16 %v1080_v24, %v1078_v22 }
 0x262   : > { %2689 = vxpose.xlu1.b32.start.end [1/1] (short) (narrow) %v2688_v19, 8 }
 0x26a   : > { %2703 = vxpose.xlu1.b32.start.end [1/1] (short) (narrow) %v2702_v25, 8 }
 0x2b9   : > { %700 = vrot.lane.b32.xlu2 %v3451_v28, %s2996_s22  ;;  %s3727_s22 = sld [smem:[#allocation20_spill]] }
 0x2bf   : > { %s2469_s26 = sshll.u32 %s3727_s22, 1  ;;  %s2273_s22 = scalar_lea.sflag [#allocation6], %s3225_s4 }
 0x2c4   : > { %704 = vrot.lane.b32.xlu1 %v3451_v28, %s2997_s12  ;;  %s3728_s12 = sld [smem:[#allocation19_spill]] }
 0x2ca   : > { %s2285_s3 = sadd.s32 %s3728_s12, %s2469_s26 }
 0x2cb   : > { %s2470_s27 = sshll.u32 %s2285_s3, 3  ;;  %s2873_s3 = scalar_lea.hbm %s3730_s5, 32 }
 0x2cc   : > { %s2287_s2 = scalar_lea.hbm %s3730_s5, %s2470_s27 }
 0x2df   : > { %2682 = vxpose.xlu2.b32.start.end [1/1] (short) (narrow) %v2681_v9, 8 }
 0x2e7   : > { %2696 = vxpose.xlu2.b32.start.end [1/1] (short) (narrow) %v2695_v59, 8 }
 0x2e9   : > { %v2662_v23 = vpop.trf.xlu2 }
 0x2ea   : > { %v2663_v32 = vunpack.i.l.bf16 %v2662_v23  ;;  %v2666_v37 = vunpack.i.h.bf16 %v2662_v23 }
 0x2ec   : > { %v1769_v26 = vrot.slane %v2663_v32, 4  ;;  %v1713_v39 = vrot.slane %v2666_v37, 4 }
 0x2ef   : > { %2710 = vxpose.xlu2.b32.start.end [1/1] (short) (narrow) %v2709_v14, 8 }
 0x2f6   : > { %v2669_v34 = vpop.trf.xlu1 }
 0x2f7   : > { %v2670_v4 = vunpack.i.l.bf16 %v2669_v34  ;;  %v2673_v42 = vunpack.i.h.bf16 %v2669_v34 }
 0x2f9   : > { %v1770_v38 = vsel %vm971_vm5, %v1769_v26, %v2670_v4  ;;  %v1763_v30 = vrot.slane %v2673_v42, 4 }
 0x2fa   : > { %v1774_v54 = vperm.slane %v1770_v38, %v3331_v60 }
 0x2fc   : > { %v1787_v29 = vrot.slane %v1774_v54, 4 }
 0x2fe   : > { %v2676_v40 = vpop.trf.xlu1 }
 0x2ff   : > { %v2680_v41 = vunpack.i.h.bf16 %v2676_v40  ;;  %v2677_v44 = vunpack.i.l.bf16 %v2676_v40 }
 0x301   : > { %v1714_v43 = vsel %vm971_vm5, %v1713_v39, %v2680_v41  ;;  %v1781_v45 = vrot.slane %v2677_v44, 4 }
 0x302   : > { %v1718_v5 = vperm.slane %v1714_v43, %v3331_v60 }
 0x304   : > { %v1731_v6 = vrot.slane %v1718_v5, 4 }
 0x306   : > { %v2690_v46 = vpop.trf.xlu1 }
 0x307   : > { %v2694_v47 = vunpack.i.h.bf16 %v2690_v46  ;;  %v2691_v49 = vunpack.i.l.bf16 %v2690_v46 }
 0x309   : > { %v1764_v50 = vsel %vm971_vm5, %v1763_v30, %v2691_v49  ;;  %v1782_v33 = vsel %vm971_vm5, %v1781_v45, %v2694_v47 }
 0x30a   : > { %v1768_v53 = vperm.slane %v1764_v50, %v3331_v60  ;;  %v1786_v10 = vperm.slane %v1782_v33, %v3331_v60 }
 0x30c   : > { %v1789_v56 = vrot.slane %v1768_v53, 4  ;;  %v1788_v58 = vsel %vm971_vm5, %v1787_v29, %v1768_v53  ;;  %v1799_v25 = vrot.slane %v1786_v10, 4 }
 0x30d   : > { %v1794_v21 = vperm.slane %v1788_v58, %v3335_v3 }
 0x30e   : > { %v2704_v51 = vpop.trf.xlu1  ;;  %v1790_v57 = vsel %vm971_vm5, %v1774_v54, %v1789_v56 }
 0x30f   : > { %v2705_v55 = vunpack.i.l.bf16 %v2704_v51  ;;  %v2708_v31 = vunpack.i.h.bf16 %v2704_v51  ;;  %v1798_v17 = vperm.slane %v1790_v57, %v3335_v3  ;;  %v1813_v39 = vrot.slane %v1794_v21, 4 }
 0x311   : > { %v1719_v9 = vrot.slane %v2708_v31, 4  ;;  %v1817_v43 = vrot.slane %v1798_v17, 4  ;;  %v1945_v31 = vld [vmem:[#allocation3] sm:$0xf] }
 0x313   : > { %v3464_v61 = vpop.permute.xlu2 %700 }
 0x378   : > { %v2683_v62 = vpop.trf.xlu2 }
 0x379   : > { %v2687_v63 = vunpack.i.h.bf16 %v2683_v62  ;;  %v2684_v0 = vunpack.i.l.bf16 %v2683_v62 }
 0x37b   : > { %v1725_v1 = vrot.slane %v2687_v63, 4  ;;  %v1707_v2 = vrot.slane %v2684_v0, 4  ;;  %v703_v63 = vpop.permute.xlu0 %702  ;;  %v705_v0 = vpop.permute.xlu1 %704 }
 0x37d   : > { %v1726_v7 = vsel %vm971_vm5, %v1725_v1, %v2705_v55 }
 0x37e   : > { %v1730_v11 = vperm.slane %v1726_v7, %v3331_v60  ;;  %v1949_v7 = vld [vmem:[#allocation3 + $0x10] sm:$0xf] }
 0x380   : > { %v2697_v15 = vpop.trf.xlu2  ;;  %v1743_v23 = vrot.slane %v1730_v11, 4 }
 0x381   : > { %v2701_v36 = vunpack.i.h.bf16 %v2697_v15  ;;  %v2698_v35 = vunpack.i.l.bf16 %v2697_v15 }
 0x383   : > { %v1708_v52 = vsel %vm971_vm5, %v1707_v2, %v2701_v36  ;;  %v1775_v59 = vrot.slane %v2698_v35, 4  ;;  %v1947_v35 = vld [vmem:[#allocation3 + $0x8] sm:$0xf] }
 0x384   : > { %v1712_v48 = vperm.slane %v1708_v52, %v3331_v60  ;;  %v1946_v52 = vld [vmem:[#allocation3 + $0x4] sm:$0xf] }
 0x386   : > { %v1733_v8 = vrot.slane %v1712_v48, 4  ;;  %v1732_v13 = vsel %vm971_vm5, %v1731_v6, %v1712_v48  ;;  %v1948_v48 = vld [vmem:[#allocation3 + $0xc] sm:$0xf]  ;;  %v1950_v6 = vld [vmem:[#allocation3 + $0x14] sm:$0xf] }
 0x387   : > { %v1738_v22 = vperm.slane %v1732_v13, %v3335_v3 }
 0x388   : > { %v2711_v12 = vpop.trf.xlu2  ;;  %v1734_v18 = vsel %vm971_vm5, %v1718_v5, %v1733_v8  ;;  %v1951_v8 = vld [vmem:[#allocation3 + $0x18] sm:$0xf] }
 0x389   : > { %v2715_v14 = vunpack.i.h.bf16 %v2711_v12  ;;  %v2712_v16 = vunpack.i.l.bf16 %v2711_v12  ;;  %v1742_v32 = vperm.slane %v1734_v18, %v3335_v3  ;;  %v1757_v41 = vrot.slane %v1738_v22, 4 }
 0x38b   : > { %v1720_v19 = vsel %vm971_vm5, %v1719_v9, %v2715_v14  ;;  %v1776_v20 = vsel %vm971_vm5, %v1775_v59, %v2712_v16  ;;  %v1761_v33 = vrot.slane %v1742_v32, 4  ;;  %v1952_v9 = vld [vmem:[#allocation3 + $0x1c] sm:$0xf]  ;;  %v1965_v59 = vrot.slane %v1951_v8, 4 }
 0x38c   : > { %v1780_v24 = vperm.slane %v1776_v20, %v3331_v60  ;;  %v1724_v27 = vperm.slane %v1720_v19, %v3331_v60  ;;  %v1971_v12 = vrot.slane %v1952_v9, 4 }
 0x38d   : > { %v1966_v18 = vsel %vm971_vm5, %v1965_v59, %v1949_v7 }
 0x38e   : > { %v1800_v26 = vsel %vm971_vm5, %v1799_v25, %v1780_v24  ;;  %v1801_v34 = vrot.slane %v1780_v24, 4  ;;  %v1744_v4 = vsel %vm971_vm5, %v1743_v23, %v1724_v27  ;;  %v1745_v37 = vrot.slane %v1724_v27, 4 }
 0x38f   : > { %v1806_v38 = vperm.slane %v1800_v26, %v3335_v3  ;;  %v1750_v40 = vperm.slane %v1744_v4, %v3335_v3  ;;  %v1972_v19 = vsel %vm971_vm5, %v1971_v12, %v1950_v6  ;;  %v1970_v20 = vperm.slane %v1966_v18, %v3331_v60 }
 0x390   : > { %v1802_v42 = vsel %vm971_vm5, %v1786_v10, %v1801_v34  ;;  %v1746_v44 = vsel %vm971_vm5, %v1730_v11, %v1745_v37  ;;  %v1953_v10 = vrot.slane %v1947_v35, 4  ;;  %v1959_v11 = vrot.slane %v1948_v48, 4 }
 0x391   : > { %v1814_v30 = vsel %vm971_vm5, %v1806_v38, %v1813_v39  ;;  %v1811_v45 = vrot.slane %v1806_v38, 4  ;;  %v1758_v46 = vsel %vm971_vm5, %v1750_v40, %v1757_v41  ;;  %v1755_v47 = vrot.slane %v1750_v40, 4 }
 0x392   : > { %1858 = vmatpush.msra.mxu3 %v1814_v30  ;;  %v1810_v49 = vperm.slane %v1802_v42, %v3335_v3  ;;  %v1754_v50 = vperm.slane %v1746_v44, %v3335_v3  ;;  %v1954_v13 = vsel %vm971_vm5, %v1953_v10, %v1945_v31  ;;  %v1960_v14 = vsel %vm971_vm5, %v1959_v11, %v1946_v52 }
 0x393   : > { %v1812_v51 = vsel %vm971_vm5, %v1811_v45, %v1794_v21  ;;  %v1756_v53 = vsel %vm971_vm5, %v1755_v47, %v1738_v22  ;;  %v1958_v16 = vperm.slane %v1954_v13, %v3331_v60  ;;  %v1976_v21 = vperm.slane %v1972_v19, %v3331_v60 }
 0x394   : > { %1836 = vmatpush.msra.mxu1 %v1812_v51  ;;  %1859 = vmatpush.msra.mxu3 %v1758_v46  ;;  %v1815_v54 = vrot.slane %v1810_v49, 4  ;;  %v1818_v56 = vsel %vm971_vm5, %v1810_v49, %v1817_v43  ;;  %v1759_v29 = vrot.slane %v1754_v50, 4  ;;  %v1762_v57 = vsel %vm971_vm5, %v1754_v50, %v1761_v33 }
 0x395   : > { %2460 = vmatmul.msk.f32.vlgmr.msra.gmra.mxu3 %vm1819_vm6, %v3464_v61  ;;  %v1979_v24 = vrot.slane %v1958_v16, 4  ;;  %v1989_v25 = vrot.slane %v1976_v21, 4  ;;  %v1991_v27 = vrot.slane %v1970_v20, 4 }
 0x396   : > { %1837 = vmatpush.msra.mxu1 %v1756_v53  ;;  %v1816_v58 = vsel %vm971_vm5, %v1815_v54, %v1798_v17  ;;  %v1760_v62 = vsel %vm971_vm5, %v1759_v29, %v1742_v32  ;;  %v1964_v17 = vperm.slane %v1960_v14, %v3331_v60 }
 0x397   : > { %1880 = vmatpush.msrb.mxu3 %v1816_v58  ;;  %2459 = vmatmul.msk.f32.vlgmr.msra.gmra.mxu1 %vm1819_vm6, %v3451_v28  ;;  %v1990_v34 = vsel %vm971_vm5, %v1989_v25, %v1970_v20  ;;  %v1992_v37 = vsel %vm971_vm5, %v1976_v21, %v1991_v27 }
 0x398   : > { %1902 = vmatpush.msrb.mxu1 %v1818_v56  ;;  %v1977_v22 = vrot.slane %v1964_v17, 4  ;;  %v1980_v32 = vsel %vm971_vm5, %v1964_v17, %v1979_v24  ;;  %v1996_v38 = vperm.slane %v1990_v34, %v3335_v3  ;;  %v2000_v39 = vperm.slane %v1992_v37, %v3335_v3 }
 0x399   : > { %1881 = vmatpush.msrb.mxu3 %v1760_v62  ;;  %v1988_v4 = vperm.slane %v1980_v32, %v3335_v3 }
 0x39a   : > { %1903 = vmatpush.msrb.mxu1 %v1762_v57  ;;  %v1978_v23 = vsel %vm971_vm5, %v1977_v22, %v1958_v16  ;;  %v2001_v42 = vrot.slane %v1996_v38, 4  ;;  %v2005_v43 = vrot.slane %v2000_v39, 4 }
 0x39b   : > { %v1984_v26 = vperm.slane %v1978_v23, %v3335_v3  ;;  %v2007_v41 = vrot.slane %v1988_v4, 4 }
 0x39c   : > { %v2006_v46 = vsel %vm971_vm5, %v2005_v43, %v1988_v4 }
 0x39d   : > { %2461 = vmatmul.msk.f32.vlgmr.msrb.gmra.mxu3 %vm1819_vm6, %v703_v63  ;;  %v2003_v40 = vrot.slane %v1984_v26, 4  ;;  %v2008_v30 = vsel %vm971_vm5, %v2000_v39, %v2007_v41  ;;  %v2002_v45 = vsel %vm971_vm5, %v2001_v42, %v1984_v26  ;;  %2073 = vmatpush.msrb.mxu0 %v2006_v46 }
 0x39e   : > { %2096 = vmatpush.msra.mxu1 %v2008_v30  ;;  %2027 = vmatpush.msra.mxu2 %v2002_v45 }
 0x39f   : > { %2462 = vmatmul.msk.f32.vlgmr.msrb.gmra.mxu1 %vm1819_vm6, %v705_v0  ;;  %v2004_v44 = vsel %vm971_vm5, %v1996_v38, %v2003_v40 }
 0x3a0   : > { %2050 = vmatpush.msra.mxu3 %v2004_v44 }
 0x414   : > { %v1839_v61 = vpop.f32.mrf.mxu1 }
 0x415   : > { %v1909_v55 = vsel %vm1908_vm7, %v1839_v61, -inf }
 0x416   : > { %1910 = vmax.xlane.f32.xlu2 %v1909_v55 }
 0x418   : > { %v1861_v1 = vpop.f32.mrf.mxu3 }
 0x419   : > { %v1912_v15 = vsel %vm1908_vm7, %v1861_v1, -inf }
 0x41a   : > { %1913 = vmax.xlane.f32.xlu0 %v1912_v15 }
 0x41c   : > { %v1905_v2 = vpop.f32.mrf.mxu1 }
 0x41d   : > { %v1918_v28 = vsel %vm1908_vm7, %v1905_v2, -inf }
 0x41e   : > { %1919 = vmax.xlane.f32.xlu2 %v1918_v28 }
 0x420   : > { %v3507_v36 = vpop.f32.mrf.mxu3 }
 0x421   : > { %v1915_v5 = vsel %vm1908_vm7, %v3507_v36, -inf }
 0x422   : > { %1916 = vmax.xlane.f32.xlu1 %v1915_v5 }
 0x489   : > { %v1911_v47 = vpop.xlane.xlu2 %1910 }
 0x48a   : > { %v1921_v49 = vsub.f32 %v1839_v61, %v1911_v47 }
 0x48c   : > { %v1925_v50 = vmul.f32 1.442695, %v1921_v49 }
 0x48d   : > { %v1914_v33 = vpop.xlane.xlu0 %1913 }
 0x48e   : > { %2717 = vpow2.f32 %v1925_v50  ;;  %v1922_v51 = vsub.f32 %v1861_v1, %v1914_v33 }
 0x490   : > { %v1927_v53 = vmul.f32 1.442695, %v1922_v51 }
 0x491   : > { %v1920_v54 = vpop.xlane.xlu2 %1919 }
 0x492   : > { %2719 = vpow2.f32 %v1927_v53  ;;  %v1924_v56 = vsub.f32 %v1905_v2, %v1920_v54 }
 0x494   : > { %v2718_v29 = vpop.eup %2717  ;;  %v1931_v57 = vmul.f32 1.442695, %v1924_v56 }
 0x495   : > { %v1917_v58 = vpop.xlane.xlu1 %1916  ;;  %2463 = vmatmul.msk.f32.vlgmr.msra.gmra.mxu2 %vm1908_vm7, %v2718_v29  ;;  %v1933_v62 = vsel %vm1908_vm7, %v2718_v29, 0.0 }
 0x496   : > { %2721 = vpow2.f32 %v1931_v57  ;;  %v1923_v63 = vsub.f32 %v3507_v36, %v1917_v58  ;;  %1934 = vadd.xlane.f32.xlu2 %v1933_v62 }
 0x498   : > { %v2720_v0 = vpop.eup %2719  ;;  %v1929_v61 = vmul.f32 1.442695, %v1923_v63 }
 0x499   : > { %2464 = vmatmul.msk.f32.vlgmr.msra.gmra.mxu3 %vm1908_vm7, %v2720_v0  ;;  %v1936_v55 = vsel %vm1908_vm7, %v2720_v0, 0.0 }
 0x49a   : > { %2723 = vpow2.f32 %v1929_v61  ;;  %1937 = vadd.xlane.f32.xlu1 %v1936_v55 }
 0x49c   : > { %v2722_v1 = vpop.eup %2721 }
 0x49d   : > { %2466 = vmatmul.msk.f32.vlgmr.msra.gmra.mxu1 %vm1908_vm7, %v2722_v1  ;;  %v1942_v28 = vsel %vm1908_vm7, %v2722_v1, 0.0 }
 0x4a0   : > { %v2724_v15 = vpop.eup %2723 }
 0x4a1   : > { %2465 = vmatmul.msk.f32.vlgmr.msrb.gmra.mxu0 %vm1908_vm7, %v2724_v15  ;;  %v1939_v2 = vsel %vm1908_vm7, %v2724_v15, 0.0 }
 0x4a2   : > { %1940 = vadd.xlane.f32.xlu0 %v1939_v2 }
 0x4aa   : > { %1943 = vadd.xlane.f32.xlu0 %v1942_v28 }
 0x509   : > { %v1935_v36 = vpop.xlane.xlu2 %1934 }
 0x50a   : > { %2725 = vrcp.f32 %v1935_v36 }
 0x50d   : > { %v1938_v31 = vpop.xlane.xlu1 %1937 }
 0x510   : > { %v2726_v35 = vpop.eup %2725 }
 0x515   : > { %v1941_v5 = vpop.xlane.xlu0 %1940 }
 0x516   : > { %2727 = vrcp.f32 %v1941_v5 }
 0x517   : > { %2729 = vrcp.f32 %v1938_v31 }
 0x518   : > { %v2029_v52 = vpop.f32.mrf.mxu2 }
 0x519   : > { %v2105_v48 = vmul.f32 %v2726_v35, %v2029_v52 }
 0x51a   : > { %v2098_v18 = vpop.f32.mrf.mxu1 }
 0x51b   : > { %v2111_v10 = vrot.slane %v2105_v48, 4 }
 0x51c   : > { %v2728_v6 = vpop.eup %2727  ;;  %v2052_v8 = vpop.f32.mrf.mxu3 }
 0x51d   : > { %v1944_v7 = vpop.xlane.xlu0 %1943  ;;  %v2730_v59 = vpop.eup %2729 }
 0x51e   : > { %2731 = vrcp.f32 %v1944_v7  ;;  %v2075_v9 = vpop.f32.mrf.mxu0  ;;  %v2106_v12 = vmul.f32 %v2730_v59, %v2052_v8 }
 0x51f   : > { %v2107_v11 = vmul.f32 %v2728_v6, %v2075_v9 }
 0x520   : > { %v2123_v20 = vrot.slane %v2106_v12, 4 }
 0x521   : > { %v2109_v13 = vrot.slane %v2107_v11, 4  ;;  %v2112_v14 = vsel %vm971_vm5, %v2107_v11, %v2111_v10 }
 0x522   : > { %v2120_v19 = vperm.slane %v2112_v14, %v3331_v60  ;;  %v2241_v14 = vld [vmem:[%s3726_s20 + $0x30] sm:$0xff] }
 0x523   : > { %v2110_v16 = vsel %vm971_vm5, %v2109_v13, %v2105_v48 }
 0x524   : > { %v2732_v17 = vpop.eup %2731  ;;  %v2116_v22 = vperm.slane %v2110_v16, %v3331_v60  ;;  %v2147_v23 = vrot.slane %v2120_v19, 4  ;;  %v2240_v16 = vld [vmem:[%s3726_s20 + $0x28] sm:$0xff] }
 0x525   : > { %v2108_v21 = vmul.f32 %v2732_v17, %v2098_v18  ;;  %v2239_v17 = vld [vmem:[%s3726_s20 + $0x20] sm:$0xff]  ;;  %v2238_v18 = vld [vmem:[%s3726_s20 + $0x18] sm:$0xff] }
 0x526   : > { %v2135_v34 = vrot.slane %v2116_v22, 4 }
 0x527   : > { %v2121_v24 = vrot.slane %v2108_v21, 4  ;;  %v2124_v25 = vsel %vm971_vm5, %v2108_v21, %v2123_v20  ;;  %v2236_v20 = vld [vmem:[%s3726_s20 + $0x8] sm:$0xff]  ;;  %v2235_v21 = vld [vmem:[%s3726_s20] sm:$0xff] }
 0x528   : > { %v2132_v27 = vperm.slane %v2124_v25, %v3331_v60 }
 0x529   : > { %v2122_v32 = vsel %vm971_vm5, %v2121_v24, %v2106_v12 }
 0x52a   : > { %v2128_v26 = vperm.slane %v2122_v32, %v3331_v60  ;;  %v2145_v4 = vrot.slane %v2132_v27, 4  ;;  %v2148_v37 = vsel %vm971_vm5, %v2132_v27, %v2147_v23 }
 0x52b   : > { %v2156_v38 = vperm.slane %v2148_v37, %v3335_v3 }
 0x52c   : > { %v2133_v39 = vrot.slane %v2128_v26, 4  ;;  %v2136_v40 = vsel %vm971_vm5, %v2128_v26, %v2135_v34  ;;  %v2146_v41 = vsel %vm971_vm5, %v2145_v4, %v2120_v19  ;;  %v2237_v19 = vld [vmem:[%s3726_s20 + $0x10] sm:$0xff]  ;;  %v2716_v26 = vld [vmem:[%s3731_s6] ss:$0 sm:$0xff] }
 0x52d   : > { %v2144_v42 = vperm.slane %v2136_v40, %v3335_v3  ;;  %v2152_v43 = vperm.slane %v2146_v41, %v3335_v3  ;;  %v2163_v44 = vrot.slane %v2156_v38, 4 }
 0x52e   : > { %v2134_v30 = vsel %vm971_vm5, %v2133_v39, %v2116_v22 }
 0x52f   : > { %v2140_v45 = vperm.slane %v2134_v30, %v3335_v3  ;;  %v2159_v46 = vrot.slane %v2144_v42, 4  ;;  %v2161_v47 = vrot.slane %v2152_v43, 4  ;;  %v2164_v49 = vsel %vm971_vm5, 0.0, %v2163_v44 }
 0x530   : > { %v2176_v50 = vsel %vm971_vm5, %v2163_v44, %v2152_v43  ;;  %v2181_v33 = vrot.slane %v2164_v49, 4 }
 0x531   : > { %v2157_v51 = vrot.slane %v2140_v45, 4  ;;  %v2162_v53 = vsel %vm971_vm5, 0.0, %v2161_v47  ;;  %v2160_v54 = vsel %vm971_vm5, 0.0, %v2159_v46  ;;  %v2165_v56 = vsel %vm971_vm5, %v2159_v46, %v2140_v45 }
 0x532   : > { %v2169_v29 = vperm.slane %v2165_v56, %v3331_v60  ;;  %v2170_v57 = vrot.slane %v2160_v54, 4  ;;  %v2180_v58 = vperm.slane %v2176_v50, %v3331_v60  ;;  %v2182_v62 = vsel %vm971_vm5, %v2181_v33, %v2162_v53 }
 0x533   : > { %v2158_v63 = vsel %vm971_vm5, 0.0, %v2157_v51  ;;  %v2186_v0 = vperm.slane %v2182_v62, %v3331_v60 }
 0x534   : > { %v2171_v61 = vsel %vm971_vm5, %v2170_v57, %v2158_v63  ;;  %v2189_v55 = vrot.slane %v2169_v29, 4  ;;  %v2201_v1 = vrot.slane %v2180_v58, 4 }
 0x535   : > { %v2175_v15 = vperm.slane %v2171_v61, %v3331_v60  ;;  %v2199_v2 = vrot.slane %v2186_v0, 4 }
 0x536   : > { %v2202_v28 = vsel %vm971_vm5, %v2186_v0, %v2201_v1 }
 0x537   : > { %v2190_v36 = vsel %vm971_vm5, %v2175_v15, %v2189_v55  ;;  %v2210_v5 = vperm.slane %v2202_v28, %v3335_v3  ;;  %v2187_v31 = vrot.slane %v2175_v15, 4  ;;  %v2200_v52 = vsel %vm971_vm5, %v2199_v2, %v2180_v58 }
 0x538   : > { %v2198_v35 = vperm.slane %v2190_v36, %v3335_v3  ;;  %v2206_v48 = vperm.slane %v2200_v52, %v3335_v3 }
 0x539   : > { %v2215_v7 = vrot.slane %v2210_v5, 4  ;;  %v2188_v6 = vsel %vm971_vm5, %v2187_v31, %v2169_v29 }
 0x53a   : > { %v2217_v8 = vrot.slane %v2198_v35, 4  ;;  %v2194_v60 = vperm.slane %v2188_v6, %v3335_v3  ;;  %v2211_v9 = vrot.slane %v2206_v48, 4  ;;  %v2242_v3 = vld [vmem:[%s3726_s20 + $0x38] sm:$0xff] }
 0x53b   : > { %v2216_v10 = vsel %vm971_vm5, %v2215_v7, %v2198_v35  ;;  %2259 = vmatpush.msrb.mxu2 %v2242_v3 }
 0x53c   : > { %2224 = vrot.lane.b32.xlu0 %v2216_v10, %s2998_s11  ;;  %v2218_v11 = vsel %vm971_vm5, %v2210_v5, %v2217_v8  ;;  %v2213_v59 = vrot.slane %v2194_v60, 4  ;;  %v2212_v12 = vsel %vm971_vm5, %v2211_v9, %v2194_v60  ;;  %s2289_s11 = sshll.u32 %s3249_s25, 4  ;;  %s2290_s11 = int_to_ptr.vmem [resolvable:$true] %s2289_s11 }
 0x53d   : > { %2228 = vrot.lane.b32.xlu1 %v2218_v11, %s2999_s19  ;;  %2260 = vmatpush.msrb.mxu2 %v2241_v14  ;;  %s2291_s19 = sshll.u32 %s2287_s2, 4  ;;  %s2292_s19 = int_to_ptr.hbm [resolvable:$true] %s2291_s19 }
 0x53e   : > { %v2214_v13 = vsel %vm971_vm5, %v2206_v48, %v2213_v59  ;;  %s2867_s12 = sshra.s32 %s2292_s19, 4  ;;  %s2868_s12 = int_to_ptr.hbm [resolvable:$true] %s2867_s12 }
 0x53f   : > { %2220 = vrot.lane.b32.xlu2 %v2214_v13, %s3000_s24  ;;  %2261 = vmatpush.msrb.mxu2 %v2240_v16  ;;  %s2869_s24 = scalar_lea.hbm %s2868_s12, 8  ;;  %p2874_p8 = scmp.lt.s32.totalorder %s2868_s12, %s3730_s5 }
 0x540   : > { %p2870_p5 = scmp.ne.s32.totalorder %s2868_s12, %s2869_s24  ;;  %p2875_p9 = scmp.lt.s32.totalorder %s2873_s3, %s2869_s24 }
 0x541   : > { %2262 = vmatpush.msrb.mxu2 %v2239_v17 }
 0x542   : > { %p2871_p3 = pnand %p2870_p5, %p3189_p13  ;;  %p2876_p11 = por %p2875_p9, %p2874_p8 }
 0x543   : > { %2263 = vmatpush.msrb.mxu2 %v2238_v18 }
 0x544   : > { %p2872_p4 = pneg %p2871_p3 }
 0x545   : > { %2264 = vmatpush.msrb.mxu2 %v2237_v19 }
 0x546   : > { %p2877_p12 = pnand %p2876_p11, %p2872_p4 }
 0x547   : > { %2265 = vmatpush.msrb.mxu2 %v2236_v20 }
 0x549   : > { %2266 = vmatpush.msrb.mxu2 %v2235_v21 }
 0x599   : > { %v2221_v22 = vpop.permute.xlu2 %2220 }
 0x59a   : > { %v2231_v24 = vsel %vm1819_vm6, %v2212_v12, %v2221_v22 }
 0x5ae   : > { %v2225_v25 = vpop.permute.xlu0 %2224 }
 0x5af   : > { %v2232_v27 = vsel %vm674_vm4, %v2231_v24, %v2225_v25  ;;  %v2229_v23 = vpop.permute.xlu1 %2228 }
 0x5b0   : > { %v2234_v32 = vsel %vm2233_vm8, %v2232_v27, %v2229_v23 }
 0x5b1   : > { %2467 = vmatmul.msk.f32.vlgmr.msrb.gmra.mxu2 %vm2247_vm9, %v2234_v32 }
 0x634   : > { %v2268_v34 = vpop.f32.mrf.mxu2 }
 0x635   : > { %v2269_v4 = vadd.f32 %v2716_v26, %v2268_v34 }
 0x637   : > { %2271 = vst.msk [vmem:[%s3249_s25] sm:$0xff] %vm674_vm4, %v2269_v4 }
 0x638   : > { %2880 = shalt.err (!%p2877_p12)
}
 0x639   : > { %2483 = dma.vmem_to_hbm [thread:$0]  (%p3189_p13), %s2290_s11, 128, %s2292_s19, %s2273_s22  }
 0x63a PF: > { %s3732_s4 = sld [smem:[#allocation18_spill]]  ;;  %p2506_p1 = scmp.ge.s32.totalorder %s2983_s15, 2 }
 0x63c   : > { %p2500_p2 = pnand %p2506_p1, %p3193_p0 }
 0x63e   : > { %p2501_p6 = pneg %p2500_p2 }
 0x640   : > { %s2303_s16 = sand.u32 1, %s3732_s4  }
 0x641   : > { %s2304_s2 = scalar_lea.sflag [#allocation6], %s2303_s16 }
 0x642   : > { %2938 = dma.done.wait (%p2501_p6), %s2304_s2, 128  }
 0x643   : > { %2940 = vsyncadd (%p2501_p6), %s2304_s2, 4294967168  ;;  %s28_s15 = sadd.s32 1, %s2983_s15   ;;  %s3734_s27 = sld [smem:[#allocation17_spill]] }
 0x644   : > { %p25_p7 = scmp.ge.s32.totalorder %s28_s15, 6   ;;  %s3735_s18 = smov %s3206_s30 }
 0x645   : > { %s3736_s8 = sld [smem:[#allocation22_spill]]  ;;  %s3738_s28 = smov %s2951_s29 }
 0x646   : > { %s3737_s17 = sld [smem:[#allocation23_spill]]  ;;  %s3739_s29 = smov %s3203_s21 }
 0x647   : > { %s3740_s30 = smov %s2959_s9  ;;  %s3741_s9 = smov %s2963_s10 }
 0x648   : > { %s3742_s10 = smov %s3735_s18  ;;  %s3743_s11 = smov %s2975_s13 }
 0x649   : > { %s3744_s12 = smov %s2979_s14  ;;  %27 = sbr.rel (!%p25_p7) target bundleno = 21 (0x15), region = 129 }
 0x64b   : > { %s3745_s13 = smov %s3736_s8 }
 0x64c   : > { %s3746_s14 = smov %s3737_s17 }
 0x64e   :  { %2310 = vsyncpa [#allocation5], 1 }
 0x64f   :  { %2312 = vsyncpa [#allocation5 + $0x1], 1 }
 0x650   :  { %2313 = vsyncpa [#allocation8], 1 }
 0x651   :  { %2315 = vsyncpa [#allocation8 + $0x1], 1 }
 0x652   :  { %2316 = vsyncpa [#allocation11], 1 }
 0x653   :  { %2317 = vsyncpa [#allocation6], 1 }
 0x654   :  { %2319 = vsyncpa [#allocation6 + $0x1], 1 }

</bundles_post_ra>
